<compile_context>
chip_gen: v5e
topology: v5e:2x2
jax: 0.10.0
libtpu: 0.0.40
codegen_flags: <defaults>
</compile_context>

<pallas_src>
import functools

import numpy as np
import jax
import jax.numpy as jnp
from jax.experimental import pallas as pl
from jax.experimental.pallas import tpu as pltpu


# ------------------------------ fused kernel ------------------------------- #

def _encoder_kernel(x_ref, w_in_ref, b_in_ref, w_dn_ref, b_dn_ref,
                    w_r1_ref, b_r1_ref, w_r2_ref, b_r2_ref,
                    w_out_ref, b_out_ref, o_ref, buf_ref,
                    *, T0, T_final, down_t, stride_t, depth, dilations,
                    halo, cp, bb, buf_t, mm_dtype):
    """Whole encoder for one batch chunk (bb elements, weights stay resident).

    buf_ref : (bb * (halo + T0 + halo), cp) VMEM scratch.  Each batch element
    owns one segment; its activation occupies rows [halo, halo+T) of the
    segment and the surrounding rows are kept at zero so they double as the
    conv zero padding.
    """
    f32 = jnp.float32

    def mm(a, w):
        # bf16 (or f32) operands, f32 accumulation on the MXU.  Weights are
        # already in mm_dtype (cast once at pack time), only `a` is cast here.
        return jnp.dot(a.astype(mm_dtype), w, preferred_element_type=f32)

    # Halo rows / padded lanes / the band above each live activation stay zero
    # for the whole kernel -> they double as conv zero padding.
    buf_ref[...] = jnp.zeros_like(buf_ref)

    for b in range(bb):                      # in-chunk batch loop (item 8)
        base = b * buf_t

        def conv_s1(T, w_tap, bias, *, K, pad, dilation, relu_in):
            """Stride-1 conv as K accumulated per-tap matmuls (no im2col slab);
            each tap reads exactly the rows it needs straight from the ref."""
            T_out = T + 2 * pad - dilation * (K - 1)
            start = base + halo - pad
            acc = None
            for k in range(K):
                xk = buf_ref[pl.ds(start + k * dilation, T_out), :]
                if relu_in:
                    xk = jnp.maximum(xk, 0.0)   # relu(0)=0, halo stays valid pad
                part = mm(xk, w_tap(k))
                acc = part if acc is None else acc + part
            return acc + bias, T_out

        # ---- conv_in: pre-im2col'd in the wrapper -> ONE dense matmul -> ReLU
        xin = x_ref[pl.ds(b * T0, T0), :]
        y = mm(xin, w_in_ref[...]) + b_in_ref[...]
        T = T0
        buf_ref[pl.ds(base + halo, T), :] = jnp.maximum(y, 0.0)

        for blk in range(down_t):
            # ---- downsample conv: k=2*stride_t, stride=stride_t, pad=stride_t//2
            s = stride_t
            pad = s // 2
            K = 2 * s
            T_out = (T + 2 * pad - K) // s + 1
            start = base + halo - pad
            acc = None
            for k in range(K):
                xk = buf_ref[pl.ds(start + k, T_out, stride=s), :]
                part = mm(xk, w_dn_ref[blk, k])
                acc = part if acc is None else acc + part
            y = acc + b_dn_ref[blk]
            buf_ref[pl.ds(base + halo, T_out), :] = y
            # T just shrank: re-zero the band above the new activation so it
            # keeps acting as right-side padding.  The T-preserving resnet
            # layers below do NOT need this (item 11).
            buf_ref[pl.ds(base + halo + T_out, halo), :] = jnp.zeros((halo, cp), f32)
            T = T_out

            # ---- Resnet1D (reverse_dilation):
            #      ReLU -> conv3(dil) -> ReLU -> conv1x1 -> + residual
            for di in range(depth):
                d = dilations[blk][di]
                xres = buf_ref[pl.ds(base + halo, T), :]          # read before store
                h, _ = conv_s1(T,
                               lambda k, blk=blk, di=di: w_r1_ref[blk, di, k],
                               b_r1_ref[blk, di],
                               K=3, pad=d, dilation=d, relu_in=True)
                y = mm(jnp.maximum(h, 0.0), w_r2_ref[blk, di]) \
                    + b_r2_ref[blk, di] + xres
                buf_ref[pl.ds(base + halo, T), :] = y

        # ---- conv_out (k=3, p=1)
        y, _ = conv_s1(T, lambda k: w_out_ref[k], b_out_ref[...],
                       K=3, pad=1, dilation=1, relu_in=False)
        o_ref[pl.ds(b * T_final, T_final), :] = y.astype(o_ref.dtype)


# --------------------------- parameter handling ----------------------------- #

def _init_conv(key, cin, cout, k):
    k1, k2 = jax.random.split(key)
    bound = 1.0 / np.sqrt(cin * k)
    w = jax.random.uniform(k1, (k, cin, cout), jnp.float32, -bound, bound)
    b = jax.random.uniform(k2, (cout,), jnp.float32, -bound, bound)
    return w, b


def make_encoder_params(key, input_emb_width, output_emb_width, down_t,
                        stride_t, width, depth, dilation_growth_rate):
    keys = iter(jax.random.split(key, 4 + down_t * (1 + 2 * depth)))
    params = {"conv_in": _init_conv(next(keys), input_emb_width, width, 3),
              "blocks": []}
    for _ in range(down_t):
        blk = {"down": _init_conv(next(keys), width, width, stride_t * 2),
               "res": []}
        # Resnet1D with reverse_dilation=True
        dils = [dilation_growth_rate ** d for d in range(depth)][::-1]
        for d in dils:
            blk["res"].append({
                "dilation": d,
                "conv1": _init_conv(next(keys), width, width, 3),
                "conv2": _init_conv(next(keys), width, width, 1),
            })
        params["blocks"].append(blk)
    params["conv_out"] = _init_conv(next(keys), width, output_emb_width, 3)
    return params


def _pad_to(a, shape):
    return jnp.pad(a, [(0, s - d) for d, s in zip(a.shape, shape)])


def pack_encoder_params(params, cp, r_in, weight_dtype):
    """Zero-pad channels to `cp`, keep weights as per-tap (K, cp, cp) stacks in
    `weight_dtype` (bf16 by default), biases in f32.  conv_in is packed as a
    DENSE (round_up(3*Cin,128), cp) im2col slab."""
    def pack_taps(w):                    # (K, Cin, Cout) -> (K, cp, cp)
        K = w.shape[0]
        return _pad_to(w, (K, cp, cp)).astype(weight_dtype)

    def pack_bias(b):                    # (Cout,) -> (1, cp)  (f32)
        return _pad_to(b, (cp,)).reshape(1, cp).astype(jnp.float32)

    w_in_raw = params["conv_in"][0]                       # (3, Cin, W)
    w_in = _pad_to(w_in_raw.reshape(-1, w_in_raw.shape[2]),
                   (r_in, cp)).astype(weight_dtype)       # dense (r_in, cp)
    b_in = pack_bias(params["conv_in"][1])

    w_dn, b_dn, w_r1, b_r1, w_r2, b_r2, dils = [], [], [], [], [], [], []
    for blk in params["blocks"]:
        w_dn.append(pack_taps(blk["down"][0]))
        b_dn.append(pack_bias(blk["down"][1]))
        r1w, r1b, r2w, r2b, bd = [], [], [], [], []
        for rb in blk["res"]:
            bd.append(int(rb["dilation"]))
            r1w.append(pack_taps(rb["conv1"][0]))
            r1b.append(pack_bias(rb["conv1"][1]))
            r2w.append(pack_taps(rb["conv2"][0])[0])      # K=1 -> (cp, cp)
            r2b.append(pack_bias(rb["conv2"][1]))
        w_r1.append(jnp.stack(r1w)); b_r1.append(jnp.stack(r1b))
        w_r2.append(jnp.stack(r2w)); b_r2.append(jnp.stack(r2b))
        dils.append(tuple(bd))

    packed = dict(
        w_in=w_in, b_in=b_in,
        w_dn=jnp.stack(w_dn), b_dn=jnp.stack(b_dn),
        w_r1=jnp.stack(w_r1), b_r1=jnp.stack(b_r1),
        w_r2=jnp.stack(w_r2), b_r2=jnp.stack(b_r2),
        w_out=pack_taps(params["conv_out"][0]), b_out=pack_bias(params["conv_out"][1]),
    )
    return packed, tuple(dils)


def _pick_batch_block(B, target):
    """Largest divisor of B that is <= target and still leaves >= 2 grid steps
    when B >= 2 (so both v7x TensorCores get a 'parallel' step)."""
    best = 1
    for bb in range(1, max(1, min(B, target)) + 1):
        if B % bb == 0 and (B // bb >= 2 or B == 1):
            best = bb
    return best


# ------------------------------ forward pass -------------------------------- #

_PACKED_ORDER = ("w_in", "b_in", "w_dn", "b_dn", "w_r1", "b_r1",
                 "w_r2", "b_r2", "w_out", "b_out")


def encoder_forward(params, x_nct, *, stride_t, compute_dtype=jnp.bfloat16,
                    batch_block=8):
    """x_nct: (B, Cin, T) PyTorch layout.  Returns (B, Cout, T_out)."""
    B, Cin, T0 = x_nct.shape
    assert stride_t >= 2 and stride_t % 2 == 0, \
        "downsample formula (pad=stride_t//2) assumes an even stride_t"

    width = params["conv_in"][0].shape[2]
    cout = params["conv_out"][0].shape[2]
    down_t = len(params["blocks"])
    depth = len(params["blocks"][0]["res"]) if down_t else 0

    cp = 128 * pl.cdiv(max(width, cout), 128)          # lane-dense channels
    r_in = 128 * pl.cdiv(3 * Cin, 128)                 # dense conv_in contraction
    packed, dilations = pack_encoder_params(params, cp, r_in, compute_dtype)

    max_pad = max([1, stride_t // 2] + [d for bd in dilations for d in bd])
    halo = 8 * pl.cdiv(max_pad, 8)                     # sublane-aligned halo
    buf_t = T0 + 2 * halo

    # Final time length (T only shrinks).
    T = T0
    for _ in range(down_t):
        T = (T + 2 * (stride_t // 2) - 2 * stride_t) // stride_t + 1
    T_final = T

    bb = _pick_batch_block(B, batch_block)
    n_chunks = B // bb

    # ---- conv_in pre-im2col (wrapper-side, one time): (B, T0, 3*Cin) -> pad
    # to r_in lanes and ship in compute dtype (halves input DMA for bf16).
    x_btc = jnp.transpose(x_nct, (0, 2, 1))
    xp = jnp.pad(x_btc, ((0, 0), (1, 1), (0, 0)))
    xi = jnp.concatenate([xp[:, k:k + T0, :] for k in range(3)], axis=-1)
    xi = jnp.pad(xi, ((0, 0), (0, 0), (0, r_in - 3 * Cin))).astype(compute_dtype)
    xi = xi.reshape(n_chunks, bb * T0, r_in)

    # ---- explicit VMEM budget (item 7): 2x (double-buffered) operands + scratch.
    itemsize = np.dtype(compute_dtype).itemsize
    weight_bytes = sum(int(packed[k].size) * packed[k].dtype.itemsize
                       for k in _PACKED_ORDER)
    block_bytes = bb * T0 * r_in * itemsize + bb * T_final * cp * 4
    scratch_bytes = bb * buf_t * cp * 4
    vmem_limit = int(min(64 * 2 ** 20,                 # v7x physical ceiling
                         2 * weight_bytes + 2 * block_bytes + scratch_bytes
                         + 8 * 2 ** 20))

    kernel = functools.partial(
        _encoder_kernel, T0=T0, T_final=T_final, down_t=down_t,
        stride_t=stride_t, depth=depth, dilations=dilations,
        halo=halo, cp=cp, bb=bb, buf_t=buf_t, mm_dtype=compute_dtype)

    def full_spec(a):
        nd = a.ndim
        return pl.BlockSpec(a.shape, lambda i, nd=nd: (0,) * nd)

    in_specs = [pl.BlockSpec((None, bb * T0, r_in), lambda i: (i, 0, 0))]
    in_specs += [full_spec(packed[k]) for k in _PACKED_ORDER]

    out = pl.pallas_call(
        kernel,
        out_shape=jax.ShapeDtypeStruct((n_chunks, bb * T_final, cp), jnp.float32),
        grid=(n_chunks,),
        in_specs=in_specs,
        out_specs=pl.BlockSpec((None, bb * T_final, cp), lambda i: (i, 0, 0)),
        scratch_shapes=[pltpu.VMEM((bb * buf_t, cp), jnp.float32)],
        compiler_params=pltpu.CompilerParams(
            dimension_semantics=("parallel",),
            vmem_limit_bytes=vmem_limit),
    )(xi, *[packed[k] for k in _PACKED_ORDER])

    out = out.reshape(B, T_final, cp)[:, :, :cout]     # drop channel padding
    return jnp.transpose(out, (0, 2, 1)).astype(x_nct.dtype)   # back to NCT


# ----------------------- pure-JAX reference (check) ------------------------- #

def _conv1d_ref(x_nct, w_kio, b, stride, padding, dilation, compute_dtype):
    w_oih = jnp.transpose(w_kio, (2, 1, 0)).astype(compute_dtype)   # (Cout,Cin,K)
    y = jax.lax.conv_general_dilated(
        x_nct.astype(compute_dtype), w_oih, window_strides=(stride,),
        padding=[(padding, padding)], rhs_dilation=(dilation,),
        dimension_numbers=("NCH", "OIH", "NCH"),
        preferred_element_type=jnp.float32)
    return y + b[None, :, None]


def encoder_ref(params, x_nct, stride_t, compute_dtype=jnp.bfloat16):
    """Reference with the same operand quantization (bf16 operands, f32 acc)."""
    w, b = params["conv_in"]
    x = jax.nn.relu(_conv1d_ref(x_nct, w, b, 1, 1, 1, compute_dtype))
    for blk in params["blocks"]:
        w, b = blk["down"]
        x = _conv1d_ref(x, w, b, stride_t, stride_t // 2, 1, compute_dtype)
        for rb in blk["res"]:
            d = rb["dilation"]
            w1, b1 = rb["conv1"]
            w2, b2 = rb["conv2"]
            h = _conv1d_ref(jax.nn.relu(x), w1, b1, 1, d, d, compute_dtype)
            x = x + _conv1d_ref(jax.nn.relu(h), w2, b2, 1, 0, 1, compute_dtype)
    w, b = params["conv_out"]
    return _conv1d_ref(x, w, b, 1, 1, 1, compute_dtype)


# ---------------------------------- main ------------------------------------ #

if __name__ == "__main__":
    input_emb_width = 4
    output_emb_width = 8
    down_t = 2
    stride_t = 2
    width = 32
    depth = 2
    dilation_growth_rate = 3
    # activation='relu', norm=None

    B, T = 2, 16
    key = jax.random.PRNGKey(0)
    kx, kp = jax.random.split(key)
    x = jax.random.normal(kx, (B, input_emb_width, T), jnp.float32)  # NCT

    params = make_encoder_params(kp, input_emb_width, output_emb_width, down_t,
                                 stride_t, width, depth, dilation_growth_rate)

    out = jax.block_until_ready(encoder_forward(params, x, stride_t=stride_t))
    ref = jax.block_until_ready(encoder_ref(params, x, stride_t))

    assert out.shape == (B, output_emb_width, T // (stride_t ** down_t)), out.shape
    err = float(np.max(np.abs(np.asarray(out) - np.asarray(ref))))
    # bf16 operands / f32 accumulation in BOTH paths -> only accumulation-order
    # noise remains; 5e-3 is a wide margin (review: relax vs f32 tolerance).
    assert np.allclose(np.asarray(out), np.asarray(ref), rtol=5e-3, atol=5e-3), err

    print("KERNEL_OK")
</pallas_src>

<mosaic_0001>
module attributes {stable_mosaic.version = 11 : i64} {
  func.func @_encoder_kernel(%arg0: i32, %arg1: memref<1x16x128xbf16, #tpu.memory_space<vmem>>, %arg2: memref<128x128xbf16, #tpu.memory_space<vmem>>, %arg3: memref<1x128xf32, #tpu.memory_space<vmem>>, %arg4: memref<2x4x128x128xbf16, #tpu.memory_space<vmem>>, %arg5: memref<2x1x128xf32, #tpu.memory_space<vmem>>, %arg6: memref<2x2x3x128x128xbf16, #tpu.memory_space<vmem>>, %arg7: memref<2x2x1x128xf32, #tpu.memory_space<vmem>>, %arg8: memref<2x2x128x128xbf16, #tpu.memory_space<vmem>>, %arg9: memref<2x2x1x128xf32, #tpu.memory_space<vmem>>, %arg10: memref<3x128x128xbf16, #tpu.memory_space<vmem>>, %arg11: memref<1x128xf32, #tpu.memory_space<vmem>>, %arg12: memref<1x4x128xf32, #tpu.memory_space<vmem>>, %arg13: memref<32x128xf32, #tpu.memory_space<vmem>>) attributes {dimension_semantics = [#tpu.dimension_semantics<parallel>], iteration_bounds = array<i64: 2>, scalar_prefetch = 0 : i64, scratch_operands = 1 : i64, tpu.core_type = #tpu.core_type<tc>, window_params = [{transform_indices = @transform_0, window_bounds = array<i64: 1, 16, 128>}, {pipeline_mode = #tpu.pipeline_mode<synchronous>, transform_indices = @transform_1, window_bounds = array<i64: 128, 128>}, {pipeline_mode = #tpu.pipeline_mode<synchronous>, transform_indices = @transform_2, window_bounds = array<i64: 1, 128>}, {pipeline_mode = #tpu.pipeline_mode<synchronous>, transform_indices = @transform_3, window_bounds = array<i64: 2, 4, 128, 128>}, {pipeline_mode = #tpu.pipeline_mode<synchronous>, transform_indices = @transform_4, window_bounds = array<i64: 2, 1, 128>}, {pipeline_mode = #tpu.pipeline_mode<synchronous>, transform_indices = @transform_5, window_bounds = array<i64: 2, 2, 3, 128, 128>}, {pipeline_mode = #tpu.pipeline_mode<synchronous>, transform_indices = @transform_6, window_bounds = array<i64: 2, 2, 1, 128>}, {pipeline_mode = #tpu.pipeline_mode<synchronous>, transform_indices = @transform_7, window_bounds = array<i64: 2, 2, 128, 128>}, {pipeline_mode = #tpu.pipeline_mode<synchronous>, transform_indices = @transform_8, window_bounds = array<i64: 2, 2, 1, 128>}, {pipeline_mode = #tpu.pipeline_mode<synchronous>, transform_indices = @transform_9, window_bounds = array<i64: 3, 128, 128>}, {pipeline_mode = #tpu.pipeline_mode<synchronous>, transform_indices = @transform_10, window_bounds = array<i64: 1, 128>}, {transform_indices = @transform_11, window_bounds = array<i64: 1, 4, 128>}]} {
    %cst = arith.constant 0.000000e+00 : f32
    %0 = vector.broadcast %cst : f32 to vector<32x128xf32>
    %c0 = arith.constant 0 : index
    %c0_0 = arith.constant 0 : index
    %1 = vector.load %arg13[%c0, %c0_0] : memref<32x128xf32, #tpu.memory_space<vmem>>, vector<32x128xf32>
    tpu.vector_store %arg13[%c0, %c0_0], %0 {strides = array<i32>} : memref<32x128xf32, #tpu.memory_space<vmem>>, vector<32x128xf32>,
    %c0_1 = arith.constant 0 : index
    %c0_2 = arith.constant 0 : index
    %c0_3 = arith.constant 0 : index
    %2 = vector.load %arg1[%c0_1, %c0_2, %c0_3] : memref<1x16x128xbf16, #tpu.memory_space<vmem>>, vector<1x16x128xbf16>
    %3 = vector.shape_cast %2 : vector<1x16x128xbf16> to vector<16x128xbf16>
    %c0_4 = arith.constant 0 : index
    %c0_5 = arith.constant 0 : index
    %4 = vector.load %arg2[%c0_4, %c0_5] : memref<128x128xbf16, #tpu.memory_space<vmem>>, vector<128x128xbf16>
    %cst_6 = arith.constant dense<0.000000e+00> : vector<16x128xf32>
    %5 = tpu.matmul %3, %4, %cst_6 {dimension_numbers = #tpu.dot_dimension_numbers<[1], [0], [0], [1], [0, 0, 1, 1], [], []>} : vector<16x128xbf16>, vector<128x128xbf16>, vector<16x128xf32> -> vector<16x128xf32>
    %c0_7 = arith.constant 0 : index
    %c0_8 = arith.constant 0 : index
    %6 = vector.load %arg3[%c0_7, %c0_8] : memref<1x128xf32, #tpu.memory_space<vmem>>, vector<1x128xf32>
    %7 = vector.broadcast %6 : vector<1x128xf32> to vector<16x128xf32>
    %8 = arith.addf %5, %7 : vector<16x128xf32>
    %cst_9 = arith.constant 0.000000e+00 : f32
    %9 = vector.broadcast %cst_9 : f32 to vector<16x128xf32>
    %10 = arith.maximumf %8, %9 : vector<16x128xf32>
    %c8 = arith.constant 8 : index
    %c0_10 = arith.constant 0 : index
    %11 = vector.load %arg13[%c8, %c0_10] : memref<32x128xf32, #tpu.memory_space<vmem>>, vector<16x128xf32>
    tpu.vector_store %arg13[%c8, %c0_10], %10 {strides = array<i32>} : memref<32x128xf32, #tpu.memory_space<vmem>>, vector<16x128xf32>,
    %c7 = arith.constant 7 : index
    %c0_11 = arith.constant 0 : index
    %12 = tpu.strided_load %arg13[%c7, %c0_11] {strides = array<i32: 2, 1>} : memref<32x128xf32, #tpu.memory_space<vmem>>, vector<8x128xf32>
    %c0_12 = arith.constant 0 : index
    %c0_13 = arith.constant 0 : index
    %c0_14 = arith.constant 0 : index
    %c0_15 = arith.constant 0 : index
    %13 = vector.load %arg4[%c0_12, %c0_13, %c0_14, %c0_15] : memref<2x4x128x128xbf16, #tpu.memory_space<vmem>>, vector<1x1x128x128xbf16>
    %14 = vector.shape_cast %13 : vector<1x1x128x128xbf16> to vector<128x128xbf16>
    %15 = arith.truncf %12 : vector<8x128xf32> to vector<8x128xbf16>
    %cst_16 = arith.constant dense<0.000000e+00> : vector<8x128xf32>
    %16 = tpu.matmul %15, %14, %cst_16 {dimension_numbers = #tpu.dot_dimension_numbers<[1], [0], [0], [1], [0, 0, 1, 1], [], []>} : vector<8x128xbf16>, vector<128x128xbf16>, vector<8x128xf32> -> vector<8x128xf32>
    %c8_17 = arith.constant 8 : index
    %c0_18 = arith.constant 0 : index
    %17 = tpu.strided_load %arg13[%c8_17, %c0_18] {strides = array<i32: 2, 1>} : memref<32x128xf32, #tpu.memory_space<vmem>>, vector<8x128xf32>
    %c0_19 = arith.constant 0 : index
    %c1 = arith.constant 1 : index
    %c0_20 = arith.constant 0 : index
    %c0_21 = arith.constant 0 : index
    %18 = vector.load %arg4[%c0_19, %c1, %c0_20, %c0_21] : memref<2x4x128x128xbf16, #tpu.memory_space<vmem>>, vector<1x1x128x128xbf16>
    %19 = vector.shape_cast %18 : vector<1x1x128x128xbf16> to vector<128x128xbf16>
    %20 = arith.truncf %17 : vector<8x128xf32> to vector<8x128xbf16>
    %cst_22 = arith.constant dense<0.000000e+00> : vector<8x128xf32>
    %21 = tpu.matmul %20, %19, %cst_22 {dimension_numbers = #tpu.dot_dimension_numbers<[1], [0], [0], [1], [0, 0, 1, 1], [], []>} : vector<8x128xbf16>, vector<128x128xbf16>, vector<8x128xf32> -> vector<8x128xf32>
    %22 = arith.addf %16, %21 : vector<8x128xf32>
    %c9 = arith.constant 9 : index
    %c0_23 = arith.constant 0 : index
    %23 = tpu.strided_load %arg13[%c9, %c0_23] {strides = array<i32: 2, 1>} : memref<32x128xf32, #tpu.memory_space<vmem>>, vector<8x128xf32>
    %c0_24 = arith.constant 0 : index
    %c2 = arith.constant 2 : index
    %c0_25 = arith.constant 0 : index
    %c0_26 = arith.constant 0 : index
    %24 = vector.load %arg4[%c0_24, %c2, %c0_25, %c0_26] : memref<2x4x128x128xbf16, #tpu.memory_space<vmem>>, vector<1x1x128x128xbf16>
    %25 = vector.shape_cast %24 : vector<1x1x128x128xbf16> to vector<128x128xbf16>
    %26 = arith.truncf %23 : vector<8x128xf32> to vector<8x128xbf16>
    %cst_27 = arith.constant dense<0.000000e+00> : vector<8x128xf32>
    %27 = tpu.matmul %26, %25, %cst_27 {dimension_numbers = #tpu.dot_dimension_numbers<[1], [0], [0], [1], [0, 0, 1, 1], [], []>} : vector<8x128xbf16>, vector<128x128xbf16>, vector<8x128xf32> -> vector<8x128xf32>
    %28 = arith.addf %22, %27 : vector<8x128xf32>
    %c10 = arith.constant 10 : index
    %c0_28 = arith.constant 0 : index
    %29 = tpu.strided_load %arg13[%c10, %c0_28] {strides = array<i32: 2, 1>} : memref<32x128xf32, #tpu.memory_space<vmem>>, vector<8x128xf32>
    %c0_29 = arith.constant 0 : index
    %c3 = arith.constant 3 : index
    %c0_30 = arith.constant 0 : index
    %c0_31 = arith.constant 0 : index
    %30 = vector.load %arg4[%c0_29, %c3, %c0_30, %c0_31] : memref<2x4x128x128xbf16, #tpu.memory_space<vmem>>, vector<1x1x128x128xbf16>
    %31 = vector.shape_cast %30 : vector<1x1x128x128xbf16> to vector<128x128xbf16>
    %32 = arith.truncf %29 : vector<8x128xf32> to vector<8x128xbf16>
    %cst_32 = arith.constant dense<0.000000e+00> : vector<8x128xf32>
    %33 = tpu.matmul %32, %31, %cst_32 {dimension_numbers = #tpu.dot_dimension_numbers<[1], [0], [0], [1], [0, 0, 1, 1], [], []>} : vector<8x128xbf16>, vector<128x128xbf16>, vector<8x128xf32> -> vector<8x128xf32>
    %34 = arith.addf %28, %33 : vector<8x128xf32>
    %c0_33 = arith.constant 0 : index
    %c0_34 = arith.constant 0 : index
    %c0_35 = arith.constant 0 : index
    %35 = vector.load %arg5[%c0_33, %c0_34, %c0_35] : memref<2x1x128xf32, #tpu.memory_space<vmem>>, vector<1x1x128xf32>
    %36 = vector.shape_cast %35 : vector<1x1x128xf32> to vector<1x128xf32>
    %37 = vector.broadcast %36 : vector<1x128xf32> to vector<8x128xf32>
    %38 = arith.addf %34, %37 : vector<8x128xf32>
    %c8_36 = arith.constant 8 : index
    %c0_37 = arith.constant 0 : index
    %39 = vector.load %arg13[%c8_36, %c0_37] : memref<32x128xf32, #tpu.memory_space<vmem>>, vector<8x128xf32>
    tpu.vector_store %arg13[%c8_36, %c0_37], %38 {strides = array<i32>} : memref<32x128xf32, #tpu.memory_space<vmem>>, vector<8x128xf32>,
    %cst_38 = arith.constant 0.000000e+00 : f32
    %40 = vector.broadcast %cst_38 : f32 to vector<8x128xf32>
    %c16 = arith.constant 16 : index
    %c0_39 = arith.constant 0 : index
    %41 = vector.load %arg13[%c16, %c0_39] : memref<32x128xf32, #tpu.memory_space<vmem>>, vector<8x128xf32>
    tpu.vector_store %arg13[%c16, %c0_39], %40 {strides = array<i32>} : memref<32x128xf32, #tpu.memory_space<vmem>>, vector<8x128xf32>,
    %c8_40 = arith.constant 8 : index
    %c0_41 = arith.constant 0 : index
    %42 = vector.load %arg13[%c8_40, %c0_41] : memref<32x128xf32, #tpu.memory_space<vmem>>, vector<8x128xf32>
    %c0_42 = arith.constant 0 : index
    %c0_43 = arith.constant 0 : index
    %c0_44 = arith.constant 0 : index
    %c0_45 = arith.constant 0 : index
    %43 = vector.load %arg7[%c0_42, %c0_43, %c0_44, %c0_45] : memref<2x2x1x128xf32, #tpu.memory_space<vmem>>, vector<1x1x1x128xf32>
    %44 = vector.shape_cast %43 : vector<1x1x1x128xf32> to vector<1x128xf32>
    %c5 = arith.constant 5 : index
    %c0_46 = arith.constant 0 : index
    %45 = vector.load %arg13[%c5, %c0_46] : memref<32x128xf32, #tpu.memory_space<vmem>>, vector<8x128xf32>
    %cst_47 = arith.constant 0.000000e+00 : f32
    %46 = vector.broadcast %cst_47 : f32 to vector<8x128xf32>
    %47 = arith.maximumf %45, %46 : vector<8x128xf32>
    %c0_48 = arith.constant 0 : index
    %c0_49 = arith.constant 0 : index
    %c0_50 = arith.constant 0 : index
    %c0_51 = arith.constant 0 : index
    %c0_52 = arith.constant 0 : index
    %48 = vector.load %arg6[%c0_48, %c0_49, %c0_50, %c0_51, %c0_52] : memref<2x2x3x128x128xbf16, #tpu.memory_space<vmem>>, vector<1x1x1x128x128xbf16>
    %49 = vector.shape_cast %48 : vector<1x1x1x128x128xbf16> to vector<128x128xbf16>
    %50 = arith.truncf %47 : vector<8x128xf32> to vector<8x128xbf16>
    %cst_53 = arith.constant dense<0.000000e+00> : vector<8x128xf32>
    %51 = tpu.matmul %50, %49, %cst_53 {dimension_numbers = #tpu.dot_dimension_numbers<[1], [0], [0], [1], [0, 0, 1, 1], [], []>} : vector<8x128xbf16>, vector<128x128xbf16>, vector<8x128xf32> -> vector<8x128xf32>
    %c8_54 = arith.constant 8 : index
    %c0_55 = arith.constant 0 : index
    %52 = vector.load %arg13[%c8_54, %c0_55] : memref<32x128xf32, #tpu.memory_space<vmem>>, vector<8x128xf32>
    %cst_56 = arith.constant 0.000000e+00 : f32
    %53 = vector.broadcast %cst_56 : f32 to vector<8x128xf32>
    %54 = arith.maximumf %52, %53 : vector<8x128xf32>
    %c0_57 = arith.constant 0 : index
    %c0_58 = arith.constant 0 : index
    %c1_59 = arith.constant 1 : index
    %c0_60 = arith.constant 0 : index
    %c0_61 = arith.constant 0 : index
    %55 = vector.load %arg6[%c0_57, %c0_58, %c1_59, %c0_60, %c0_61] : memref<2x2x3x128x128xbf16, #tpu.memory_space<vmem>>, vector<1x1x1x128x128xbf16>
    %56 = vector.shape_cast %55 : vector<1x1x1x128x128xbf16> to vector<128x128xbf16>
    %57 = arith.truncf %54 : vector<8x128xf32> to vector<8x128xbf16>
    %cst_62 = arith.constant dense<0.000000e+00> : vector<8x128xf32>
    %58 = tpu.matmul %57, %56, %cst_62 {dimension_numbers = #tpu.dot_dimension_numbers<[1], [0], [0], [1], [0, 0, 1, 1], [], []>} : vector<8x128xbf16>, vector<128x128xbf16>, vector<8x128xf32> -> vector<8x128xf32>
    %59 = arith.addf %51, %58 : vector<8x128xf32>
    %c11 = arith.constant 11 : index
    %c0_63 = arith.constant 0 : index
    %60 = vector.load %arg13[%c11, %c0_63] : memref<32x128xf32, #tpu.memory_space<vmem>>, vector<8x128xf32>
    %cst_64 = arith.constant 0.000000e+00 : f32
    %61 = vector.broadcast %cst_64 : f32 to vector<8x128xf32>
    %62 = arith.maximumf %60, %61 : vector<8x128xf32>
    %c0_65 = arith.constant 0 : index
    %c0_66 = arith.constant 0 : index
    %c2_67 = arith.constant 2 : index
    %c0_68 = arith.constant 0 : index
    %c0_69 = arith.constant 0 : index
    %63 = vector.load %arg6[%c0_65, %c0_66, %c2_67, %c0_68, %c0_69] : memref<2x2x3x128x128xbf16, #tpu.memory_space<vmem>>, vector<1x1x1x128x128xbf16>
    %64 = vector.shape_cast %63 : vector<1x1x1x128x128xbf16> to vector<128x128xbf16>
    %65 = arith.truncf %62 : vector<8x128xf32> to vector<8x128xbf16>
    %cst_70 = arith.constant dense<0.000000e+00> : vector<8x128xf32>
    %66 = tpu.matmul %65, %64, %cst_70 {dimension_numbers = #tpu.dot_dimension_numbers<[1], [0], [0], [1], [0, 0, 1, 1], [], []>} : vector<8x128xbf16>, vector<128x128xbf16>, vector<8x128xf32> -> vector<8x128xf32>
    %67 = arith.addf %59, %66 : vector<8x128xf32>
    %68 = vector.broadcast %44 : vector<1x128xf32> to vector<8x128xf32>
    %69 = arith.addf %67, %68 : vector<8x128xf32>
    %cst_71 = arith.constant 0.000000e+00 : f32
    %70 = vector.broadcast %cst_71 : f32 to vector<8x128xf32>
    %71 = arith.maximumf %69, %70 : vector<8x128xf32>
    %c0_72 = arith.constant 0 : index
    %c0_73 = arith.constant 0 : index
    %c0_74 = arith.constant 0 : index
    %c0_75 = arith.constant 0 : index
    %72 = vector.load %arg8[%c0_72, %c0_73, %c0_74, %c0_75] : memref<2x2x128x128xbf16, #tpu.memory_space<vmem>>, vector<1x1x128x128xbf16>
    %73 = vector.shape_cast %72 : vector<1x1x128x128xbf16> to vector<128x128xbf16>
    %74 = arith.truncf %71 : vector<8x128xf32> to vector<8x128xbf16>
    %cst_76 = arith.constant dense<0.000000e+00> : vector<8x128xf32>
    %75 = tpu.matmul %74, %73, %cst_76 {dimension_numbers = #tpu.dot_dimension_numbers<[1], [0], [0], [1], [0, 0, 1, 1], [], []>} : vector<8x128xbf16>, vector<128x128xbf16>, vector<8x128xf32> -> vector<8x128xf32>
    %c0_77 = arith.constant 0 : index
    %c0_78 = arith.constant 0 : index
    %c0_79 = arith.constant 0 : index
    %c0_80 = arith.constant 0 : index
    %76 = vector.load %arg9[%c0_77, %c0_78, %c0_79, %c0_80] : memref<2x2x1x128xf32, #tpu.memory_space<vmem>>, vector<1x1x1x128xf32>
    %77 = vector.shape_cast %76 : vector<1x1x1x128xf32> to vector<1x128xf32>
    %78 = vector.broadcast %77 : vector<1x128xf32> to vector<8x128xf32>
    %79 = arith.addf %75, %78 : vector<8x128xf32>
    %80 = arith.addf %79, %42 : vector<8x128xf32>
    %c8_81 = arith.constant 8 : index
    %c0_82 = arith.constant 0 : index
    %81 = vector.load %arg13[%c8_81, %c0_82] : memref<32x128xf32, #tpu.memory_space<vmem>>, vector<8x128xf32>
    tpu.vector_store %arg13[%c8_81, %c0_82], %80 {strides = array<i32>} : memref<32x128xf32, #tpu.memory_space<vmem>>, vector<8x128xf32>,
    %c8_83 = arith.constant 8 : index
    %c0_84 = arith.constant 0 : index
    %82 = vector.load %arg13[%c8_83, %c0_84] : memref<32x128xf32, #tpu.memory_space<vmem>>, vector<8x128xf32>
    %c0_85 = arith.constant 0 : index
    %c1_86 = arith.constant 1 : index
    %c0_87 = arith.constant 0 : index
    %c0_88 = arith.constant 0 : index
    %83 = vector.load %arg7[%c0_85, %c1_86, %c0_87, %c0_88] : memref<2x2x1x128xf32, #tpu.memory_space<vmem>>, vector<1x1x1x128xf32>
    %84 = vector.shape_cast %83 : vector<1x1x1x128xf32> to vector<1x128xf32>
    %c7_89 = arith.constant 7 : index
    %c0_90 = arith.constant 0 : index
    %85 = vector.load %arg13[%c7_89, %c0_90] : memref<32x128xf32, #tpu.memory_space<vmem>>, vector<8x128xf32>
    %cst_91 = arith.constant 0.000000e+00 : f32
    %86 = vector.broadcast %cst_91 : f32 to vector<8x128xf32>
    %87 = arith.maximumf %85, %86 : vector<8x128xf32>
    %c0_92 = arith.constant 0 : index
    %c1_93 = arith.constant 1 : index
    %c0_94 = arith.constant 0 : index
    %c0_95 = arith.constant 0 : index
    %c0_96 = arith.constant 0 : index
    %88 = vector.load %arg6[%c0_92, %c1_93, %c0_94, %c0_95, %c0_96] : memref<2x2x3x128x128xbf16, #tpu.memory_space<vmem>>, vector<1x1x1x128x128xbf16>
    %89 = vector.shape_cast %88 : vector<1x1x1x128x128xbf16> to vector<128x128xbf16>
    %90 = arith.truncf %87 : vector<8x128xf32> to vector<8x128xbf16>
    %cst_97 = arith.constant dense<0.000000e+00> : vector<8x128xf32>
    %91 = tpu.matmul %90, %89, %cst_97 {dimension_numbers = #tpu.dot_dimension_numbers<[1], [0], [0], [1], [0, 0, 1, 1], [], []>} : vector<8x128xbf16>, vector<128x128xbf16>, vector<8x128xf32> -> vector<8x128xf32>
    %c8_98 = arith.constant 8 : index
    %c0_99 = arith.constant 0 : index
    %92 = vector.load %arg13[%c8_98, %c0_99] : memref<32x128xf32, #tpu.memory_space<vmem>>, vector<8x128xf32>
    %cst_100 = arith.constant 0.000000e+00 : f32
    %93 = vector.broadcast %cst_100 : f32 to vector<8x128xf32>
    %94 = arith.maximumf %92, %93 : vector<8x128xf32>
    %c0_101 = arith.constant 0 : index
    %c1_102 = arith.constant 1 : index
    %c1_103 = arith.constant 1 : index
    %c0_104 = arith.constant 0 : index
    %c0_105 = arith.constant 0 : index
    %95 = vector.load %arg6[%c0_101, %c1_102, %c1_103, %c0_104, %c0_105] : memref<2x2x3x128x128xbf16, #tpu.memory_space<vmem>>, vector<1x1x1x128x128xbf16>
    %96 = vector.shape_cast %95 : vector<1x1x1x128x128xbf16> to vector<128x128xbf16>
    %97 = arith.truncf %94 : vector<8x128xf32> to vector<8x128xbf16>
    %cst_106 = arith.constant dense<0.000000e+00> : vector<8x128xf32>
    %98 = tpu.matmul %97, %96, %cst_106 {dimension_numbers = #tpu.dot_dimension_numbers<[1], [0], [0], [1], [0, 0, 1, 1], [], []>} : vector<8x128xbf16>, vector<128x128xbf16>, vector<8x128xf32> -> vector<8x128xf32>
    %99 = arith.addf %91, %98 : vector<8x128xf32>
    %c9_107 = arith.constant 9 : index
    %c0_108 = arith.constant 0 : index
    %100 = vector.load %arg13[%c9_107, %c0_108] : memref<32x128xf32, #tpu.memory_space<vmem>>, vector<8x128xf32>
    %cst_109 = arith.constant 0.000000e+00 : f32
    %101 = vector.broadcast %cst_109 : f32 to vector<8x128xf32>
    %102 = arith.maximumf %100, %101 : vector<8x128xf32>
    %c0_110 = arith.constant 0 : index
    %c1_111 = arith.constant 1 : index
    %c2_112 = arith.constant 2 : index
    %c0_113 = arith.constant 0 : index
    %c0_114 = arith.constant 0 : index
    %103 = vector.load %arg6[%c0_110, %c1_111, %c2_112, %c0_113, %c0_114] : memref<2x2x3x128x128xbf16, #tpu.memory_space<vmem>>, vector<1x1x1x128x128xbf16>
    %104 = vector.shape_cast %103 : vector<1x1x1x128x128xbf16> to vector<128x128xbf16>
    %105 = arith.truncf %102 : vector<8x128xf32> to vector<8x128xbf16>
    %cst_115 = arith.constant dense<0.000000e+00> : vector<8x128xf32>
    %106 = tpu.matmul %105, %104, %cst_115 {dimension_numbers = #tpu.dot_dimension_numbers<[1], [0], [0], [1], [0, 0, 1, 1], [], []>} : vector<8x128xbf16>, vector<128x128xbf16>, vector<8x128xf32> -> vector<8x128xf32>
    %107 = arith.addf %99, %106 : vector<8x128xf32>
    %108 = vector.broadcast %84 : vector<1x128xf32> to vector<8x128xf32>
    %109 = arith.addf %107, %108 : vector<8x128xf32>
    %cst_116 = arith.constant 0.000000e+00 : f32
    %110 = vector.broadcast %cst_116 : f32 to vector<8x128xf32>
    %111 = arith.maximumf %109, %110 : vector<8x128xf32>
    %c0_117 = arith.constant 0 : index
    %c1_118 = arith.constant 1 : index
    %c0_119 = arith.constant 0 : index
    %c0_120 = arith.constant 0 : index
    %112 = vector.load %arg8[%c0_117, %c1_118, %c0_119, %c0_120] : memref<2x2x128x128xbf16, #tpu.memory_space<vmem>>, vector<1x1x128x128xbf16>
    %113 = vector.shape_cast %112 : vector<1x1x128x128xbf16> to vector<128x128xbf16>
    %114 = arith.truncf %111 : vector<8x128xf32> to vector<8x128xbf16>
    %cst_121 = arith.constant dense<0.000000e+00> : vector<8x128xf32>
    %115 = tpu.matmul %114, %113, %cst_121 {dimension_numbers = #tpu.dot_dimension_numbers<[1], [0], [0], [1], [0, 0, 1, 1], [], []>} : vector<8x128xbf16>, vector<128x128xbf16>, vector<8x128xf32> -> vector<8x128xf32>
    %c0_122 = arith.constant 0 : index
    %c1_123 = arith.constant 1 : index
    %c0_124 = arith.constant 0 : index
    %c0_125 = arith.constant 0 : index
    %116 = vector.load %arg9[%c0_122, %c1_123, %c0_124, %c0_125] : memref<2x2x1x128xf32, #tpu.memory_space<vmem>>, vector<1x1x1x128xf32>
    %117 = vector.shape_cast %116 : vector<1x1x1x128xf32> to vector<1x128xf32>
    %118 = vector.broadcast %117 : vector<1x128xf32> to vector<8x128xf32>
    %119 = arith.addf %115, %118 : vector<8x128xf32>
    %120 = arith.addf %119, %82 : vector<8x128xf32>
    %c8_126 = arith.constant 8 : index
    %c0_127 = arith.constant 0 : index
    %121 = vector.load %arg13[%c8_126, %c0_127] : memref<32x128xf32, #tpu.memory_space<vmem>>, vector<8x128xf32>
    tpu.vector_store %arg13[%c8_126, %c0_127], %120 {strides = array<i32>} : memref<32x128xf32, #tpu.memory_space<vmem>>, vector<8x128xf32>,
    %c7_128 = arith.constant 7 : index
    %c0_129 = arith.constant 0 : index
    %122 = tpu.strided_load %arg13[%c7_128, %c0_129] {strides = array<i32: 2, 1>} : memref<32x128xf32, #tpu.memory_space<vmem>>, vector<4x128xf32>
    %c1_130 = arith.constant 1 : index
    %c0_131 = arith.constant 0 : index
    %c0_132 = arith.constant 0 : index
    %c0_133 = arith.constant 0 : index
    %123 = vector.load %arg4[%c1_130, %c0_131, %c0_132, %c0_133] : memref<2x4x128x128xbf16, #tpu.memory_space<vmem>>, vector<1x1x128x128xbf16>
    %124 = vector.shape_cast %123 : vector<1x1x128x128xbf16> to vector<128x128xbf16>
    %125 = arith.truncf %122 : vector<4x128xf32> to vector<4x128xbf16>
    %cst_134 = arith.constant dense<0.000000e+00> : vector<4x128xf32>
    %126 = tpu.matmul %125, %124, %cst_134 {dimension_numbers = #tpu.dot_dimension_numbers<[1], [0], [0], [1], [0, 0, 1, 1], [], []>} : vector<4x128xbf16>, vector<128x128xbf16>, vector<4x128xf32> -> vector<4x128xf32>
    %c8_135 = arith.constant 8 : index
    %c0_136 = arith.constant 0 : index
    %127 = tpu.strided_load %arg13[%c8_135, %c0_136] {strides = array<i32: 2, 1>} : memref<32x128xf32, #tpu.memory_space<vmem>>, vector<4x128xf32>
    %c1_137 = arith.constant 1 : index
    %c1_138 = arith.constant 1 : index
    %c0_139 = arith.constant 0 : index
    %c0_140 = arith.constant 0 : index
    %128 = vector.load %arg4[%c1_137, %c1_138, %c0_139, %c0_140] : memref<2x4x128x128xbf16, #tpu.memory_space<vmem>>, vector<1x1x128x128xbf16>
    %129 = vector.shape_cast %128 : vector<1x1x128x128xbf16> to vector<128x128xbf16>
    %130 = arith.truncf %127 : vector<4x128xf32> to vector<4x128xbf16>
    %cst_141 = arith.constant dense<0.000000e+00> : vector<4x128xf32>
    %131 = tpu.matmul %130, %129, %cst_141 {dimension_numbers = #tpu.dot_dimension_numbers<[1], [0], [0], [1], [0, 0, 1, 1], [], []>} : vector<4x128xbf16>, vector<128x128xbf16>, vector<4x128xf32> -> vector<4x128xf32>
    %132 = arith.addf %126, %131 : vector<4x128xf32>
    %c9_142 = arith.constant 9 : index
    %c0_143 = arith.constant 0 : index
    %133 = tpu.strided_load %arg13[%c9_142, %c0_143] {strides = array<i32: 2, 1>} : memref<32x128xf32, #tpu.memory_space<vmem>>, vector<4x128xf32>
    %c1_144 = arith.constant 1 : index
    %c2_145 = arith.constant 2 : index
    %c0_146 = arith.constant 0 : index
    %c0_147 = arith.constant 0 : index
    %134 = vector.load %arg4[%c1_144, %c2_145, %c0_146, %c0_147] : memref<2x4x128x128xbf16, #tpu.memory_space<vmem>>, vector<1x1x128x128xbf16>
    %135 = vector.shape_cast %134 : vector<1x1x128x128xbf16> to vector<128x128xbf16>
    %136 = arith.truncf %133 : vector<4x128xf32> to vector<4x128xbf16>
    %cst_148 = arith.constant dense<0.000000e+00> : vector<4x128xf32>
    %137 = tpu.matmul %136, %135, %cst_148 {dimension_numbers = #tpu.dot_dimension_numbers<[1], [0], [0], [1], [0, 0, 1, 1], [], []>} : vector<4x128xbf16>, vector<128x128xbf16>, vector<4x128xf32> -> vector<4x128xf32>
    %138 = arith.addf %132, %137 : vector<4x128xf32>
    %c10_149 = arith.constant 10 : index
    %c0_150 = arith.constant 0 : index
    %139 = tpu.strided_load %arg13[%c10_149, %c0_150] {strides = array<i32: 2, 1>} : memref<32x128xf32, #tpu.memory_space<vmem>>, vector<4x128xf32>
    %c1_151 = arith.constant 1 : index
    %c3_152 = arith.constant 3 : index
    %c0_153 = arith.constant 0 : index
    %c0_154 = arith.constant 0 : index
    %140 = vector.load %arg4[%c1_151, %c3_152, %c0_153, %c0_154] : memref<2x4x128x128xbf16, #tpu.memory_space<vmem>>, vector<1x1x128x128xbf16>
    %141 = vector.shape_cast %140 : vector<1x1x128x128xbf16> to vector<128x128xbf16>
    %142 = arith.truncf %139 : vector<4x128xf32> to vector<4x128xbf16>
    %cst_155 = arith.constant dense<0.000000e+00> : vector<4x128xf32>
    %143 = tpu.matmul %142, %141, %cst_155 {dimension_numbers = #tpu.dot_dimension_numbers<[1], [0], [0], [1], [0, 0, 1, 1], [], []>} : vector<4x128xbf16>, vector<128x128xbf16>, vector<4x128xf32> -> vector<4x128xf32>
    %144 = arith.addf %138, %143 : vector<4x128xf32>
    %c1_156 = arith.constant 1 : index
    %c0_157 = arith.constant 0 : index
    %c0_158 = arith.constant 0 : index
    %145 = vector.load %arg5[%c1_156, %c0_157, %c0_158] : memref<2x1x128xf32, #tpu.memory_space<vmem>>, vector<1x1x128xf32>
    %146 = vector.shape_cast %145 : vector<1x1x128xf32> to vector<1x128xf32>
    %147 = vector.broadcast %146 : vector<1x128xf32> to vector<4x128xf32>
    %148 = arith.addf %144, %147 : vector<4x128xf32>
    %c8_159 = arith.constant 8 : index
    %c0_160 = arith.constant 0 : index
    %149 = vector.load %arg13[%c8_159, %c0_160] : memref<32x128xf32, #tpu.memory_space<vmem>>, vector<4x128xf32>
    tpu.vector_store %arg13[%c8_159, %c0_160], %148 {strides = array<i32>} : memref<32x128xf32, #tpu.memory_space<vmem>>, vector<4x128xf32>,
    %cst_161 = arith.constant 0.000000e+00 : f32
    %150 = vector.broadcast %cst_161 : f32 to vector<8x128xf32>
    %c12 = arith.constant 12 : index
    %c0_162 = arith.constant 0 : index
    %151 = vector.load %arg13[%c12, %c0_162] : memref<32x128xf32, #tpu.memory_space<vmem>>, vector<8x128xf32>
    tpu.vector_store %arg13[%c12, %c0_162], %150 {strides = array<i32>} : memref<32x128xf32, #tpu.memory_space<vmem>>, vector<8x128xf32>,
    %c8_163 = arith.constant 8 : index
    %c0_164 = arith.constant 0 : index
    %152 = vector.load %arg13[%c8_163, %c0_164] : memref<32x128xf32, #tpu.memory_space<vmem>>, vector<4x128xf32>
    %c1_165 = arith.constant 1 : index
    %c0_166 = arith.constant 0 : index
    %c0_167 = arith.constant 0 : index
    %c0_168 = arith.constant 0 : index
    %153 = vector.load %arg7[%c1_165, %c0_166, %c0_167, %c0_168] : memref<2x2x1x128xf32, #tpu.memory_space<vmem>>, vector<1x1x1x128xf32>
    %154 = vector.shape_cast %153 : vector<1x1x1x128xf32> to vector<1x128xf32>
    %c5_169 = arith.constant 5 : index
    %c0_170 = arith.constant 0 : index
    %155 = vector.load %arg13[%c5_169, %c0_170] : memref<32x128xf32, #tpu.memory_space<vmem>>, vector<4x128xf32>
    %cst_171 = arith.constant 0.000000e+00 : f32
    %156 = vector.broadcast %cst_171 : f32 to vector<4x128xf32>
    %157 = arith.maximumf %155, %156 : vector<4x128xf32>
    %c1_172 = arith.constant 1 : index
    %c0_173 = arith.constant 0 : index
    %c0_174 = arith.constant 0 : index
    %c0_175 = arith.constant 0 : index
    %c0_176 = arith.constant 0 : index
    %158 = vector.load %arg6[%c1_172, %c0_173, %c0_174, %c0_175, %c0_176] : memref<2x2x3x128x128xbf16, #tpu.memory_space<vmem>>, vector<1x1x1x128x128xbf16>
    %159 = vector.shape_cast %158 : vector<1x1x1x128x128xbf16> to vector<128x128xbf16>
    %160 = arith.truncf %157 : vector<4x128xf32> to vector<4x128xbf16>
    %cst_177 = arith.constant dense<0.000000e+00> : vector<4x128xf32>
    %161 = tpu.matmul %160, %159, %cst_177 {dimension_numbers = #tpu.dot_dimension_numbers<[1], [0], [0], [1], [0, 0, 1, 1], [], []>} : vector<4x128xbf16>, vector<128x128xbf16>, vector<4x128xf32> -> vector<4x128xf32>
    %c8_178 = arith.constant 8 : index
    %c0_179 = arith.constant 0 : index
    %162 = vector.load %arg13[%c8_178, %c0_179] : memref<32x128xf32, #tpu.memory_space<vmem>>, vector<4x128xf32>
    %cst_180 = arith.constant 0.000000e+00 : f32
    %163 = vector.broadcast %cst_180 : f32 to vector<4x128xf32>
    %164 = arith.maximumf %162, %163 : vector<4x128xf32>
    %c1_181 = arith.constant 1 : index
    %c0_182 = arith.constant 0 : index
    %c1_183 = arith.constant 1 : index
    %c0_184 = arith.constant 0 : index
    %c0_185 = arith.constant 0 : index
    %165 = vector.load %arg6[%c1_181, %c0_182, %c1_183, %c0_184, %c0_185] : memref<2x2x3x128x128xbf16, #tpu.memory_space<vmem>>, vector<1x1x1x128x128xbf16>
    %166 = vector.shape_cast %165 : vector<1x1x1x128x128xbf16> to vector<128x128xbf16>
    %167 = arith.truncf %164 : vector<4x128xf32> to vector<4x128xbf16>
    %cst_186 = arith.constant dense<0.000000e+00> : vector<4x128xf32>
    %168 = tpu.matmul %167, %166, %cst_186 {dimension_numbers = #tpu.dot_dimension_numbers<[1], [0], [0], [1], [0, 0, 1, 1], [], []>} : vector<4x128xbf16>, vector<128x128xbf16>, vector<4x128xf32> -> vector<4x128xf32>
    %169 = arith.addf %161, %168 : vector<4x128xf32>
    %c11_187 = arith.constant 11 : index
    %c0_188 = arith.constant 0 : index
    %170 = vector.load %arg13[%c11_187, %c0_188] : memref<32x128xf32, #tpu.memory_space<vmem>>, vector<4x128xf32>
    %cst_189 = arith.constant 0.000000e+00 : f32
    %171 = vector.broadcast %cst_189 : f32 to vector<4x128xf32>
    %172 = arith.maximumf %170, %171 : vector<4x128xf32>
    %c1_190 = arith.constant 1 : index
    %c0_191 = arith.constant 0 : index
    %c2_192 = arith.constant 2 : index
    %c0_193 = arith.constant 0 : index
    %c0_194 = arith.constant 0 : index
    %173 = vector.load %arg6[%c1_190, %c0_191, %c2_192, %c0_193, %c0_194] : memref<2x2x3x128x128xbf16, #tpu.memory_space<vmem>>, vector<1x1x1x128x128xbf16>
    %174 = vector.shape_cast %173 : vector<1x1x1x128x128xbf16> to vector<128x128xbf16>
    %175 = arith.truncf %172 : vector<4x128xf32> to vector<4x128xbf16>
    %cst_195 = arith.constant dense<0.000000e+00> : vector<4x128xf32>
    %176 = tpu.matmul %175, %174, %cst_195 {dimension_numbers = #tpu.dot_dimension_numbers<[1], [0], [0], [1], [0, 0, 1, 1], [], []>} : vector<4x128xbf16>, vector<128x128xbf16>, vector<4x128xf32> -> vector<4x128xf32>
    %177 = arith.addf %169, %176 : vector<4x128xf32>
    %178 = vector.broadcast %154 : vector<1x128xf32> to vector<4x128xf32>
    %179 = arith.addf %177, %178 : vector<4x128xf32>
    %cst_196 = arith.constant 0.000000e+00 : f32
    %180 = vector.broadcast %cst_196 : f32 to vector<4x128xf32>
    %181 = arith.maximumf %179, %180 : vector<4x128xf32>
    %c1_197 = arith.constant 1 : index
    %c0_198 = arith.constant 0 : index
    %c0_199 = arith.constant 0 : index
    %c0_200 = arith.constant 0 : index
    %182 = vector.load %arg8[%c1_197, %c0_198, %c0_199, %c0_200] : memref<2x2x128x128xbf16, #tpu.memory_space<vmem>>, vector<1x1x128x128xbf16>
    %183 = vector.shape_cast %182 : vector<1x1x128x128xbf16> to vector<128x128xbf16>
    %184 = arith.truncf %181 : vector<4x128xf32> to vector<4x128xbf16>
    %cst_201 = arith.constant dense<0.000000e+00> : vector<4x128xf32>
    %185 = tpu.matmul %184, %183, %cst_201 {dimension_numbers = #tpu.dot_dimension_numbers<[1], [0], [0], [1], [0, 0, 1, 1], [], []>} : vector<4x128xbf16>, vector<128x128xbf16>, vector<4x128xf32> -> vector<4x128xf32>
    %c1_202 = arith.constant 1 : index
    %c0_203 = arith.constant 0 : index
    %c0_204 = arith.constant 0 : index
    %c0_205 = arith.constant 0 : index
    %186 = vector.load %arg9[%c1_202, %c0_203, %c0_204, %c0_205] : memref<2x2x1x128xf32, #tpu.memory_space<vmem>>, vector<1x1x1x128xf32>
    %187 = vector.shape_cast %186 : vector<1x1x1x128xf32> to vector<1x128xf32>
    %188 = vector.broadcast %187 : vector<1x128xf32> to vector<4x128xf32>
    %189 = arith.addf %185, %188 : vector<4x128xf32>
    %190 = arith.addf %189, %152 : vector<4x128xf32>
    %c8_206 = arith.constant 8 : index
    %c0_207 = arith.constant 0 : index
    %191 = vector.load %arg13[%c8_206, %c0_207] : memref<32x128xf32, #tpu.memory_space<vmem>>, vector<4x128xf32>
    tpu.vector_store %arg13[%c8_206, %c0_207], %190 {strides = array<i32>} : memref<32x128xf32, #tpu.memory_space<vmem>>, vector<4x128xf32>,
    %c8_208 = arith.constant 8 : index
    %c0_209 = arith.constant 0 : index
    %192 = vector.load %arg13[%c8_208, %c0_209] : memref<32x128xf32, #tpu.memory_space<vmem>>, vector<4x128xf32>
    %c1_210 = arith.constant 1 : index
    %c1_211 = arith.constant 1 : index
    %c0_212 = arith.constant 0 : index
    %c0_213 = arith.constant 0 : index
    %193 = vector.load %arg7[%c1_210, %c1_211, %c0_212, %c0_213] : memref<2x2x1x128xf32, #tpu.memory_space<vmem>>, vector<1x1x1x128xf32>
    %194 = vector.shape_cast %193 : vector<1x1x1x128xf32> to vector<1x128xf32>
    %c7_214 = arith.constant 7 : index
    %c0_215 = arith.constant 0 : index
    %195 = vector.load %arg13[%c7_214, %c0_215] : memref<32x128xf32, #tpu.memory_space<vmem>>, vector<4x128xf32>
    %cst_216 = arith.constant 0.000000e+00 : f32
    %196 = vector.broadcast %cst_216 : f32 to vector<4x128xf32>
    %197 = arith.maximumf %195, %196 : vector<4x128xf32>
    %c1_217 = arith.constant 1 : index
    %c1_218 = arith.constant 1 : index
    %c0_219 = arith.constant 0 : index
    %c0_220 = arith.constant 0 : index
    %c0_221 = arith.constant 0 : index
    %198 = vector.load %arg6[%c1_217, %c1_218, %c0_219, %c0_220, %c0_221] : memref<2x2x3x128x128xbf16, #tpu.memory_space<vmem>>, vector<1x1x1x128x128xbf16>
    %199 = vector.shape_cast %198 : vector<1x1x1x128x128xbf16> to vector<128x128xbf16>
    %200 = arith.truncf %197 : vector<4x128xf32> to vector<4x128xbf16>
    %cst_222 = arith.constant dense<0.000000e+00> : vector<4x128xf32>
    %201 = tpu.matmul %200, %199, %cst_222 {dimension_numbers = #tpu.dot_dimension_numbers<[1], [0], [0], [1], [0, 0, 1, 1], [], []>} : vector<4x128xbf16>, vector<128x128xbf16>, vector<4x128xf32> -> vector<4x128xf32>
    %c8_223 = arith.constant 8 : index
    %c0_224 = arith.constant 0 : index
    %202 = vector.load %arg13[%c8_223, %c0_224] : memref<32x128xf32, #tpu.memory_space<vmem>>, vector<4x128xf32>
    %cst_225 = arith.constant 0.000000e+00 : f32
    %203 = vector.broadcast %cst_225 : f32 to vector<4x128xf32>
    %204 = arith.maximumf %202, %203 : vector<4x128xf32>
    %c1_226 = arith.constant 1 : index
    %c1_227 = arith.constant 1 : index
    %c1_228 = arith.constant 1 : index
    %c0_229 = arith.constant 0 : index
    %c0_230 = arith.constant 0 : index
    %205 = vector.load %arg6[%c1_226, %c1_227, %c1_228, %c0_229, %c0_230] : memref<2x2x3x128x128xbf16, #tpu.memory_space<vmem>>, vector<1x1x1x128x128xbf16>
    %206 = vector.shape_cast %205 : vector<1x1x1x128x128xbf16> to vector<128x128xbf16>
    %207 = arith.truncf %204 : vector<4x128xf32> to vector<4x128xbf16>
    %cst_231 = arith.constant dense<0.000000e+00> : vector<4x128xf32>
    %208 = tpu.matmul %207, %206, %cst_231 {dimension_numbers = #tpu.dot_dimension_numbers<[1], [0], [0], [1], [0, 0, 1, 1], [], []>} : vector<4x128xbf16>, vector<128x128xbf16>, vector<4x128xf32> -> vector<4x128xf32>
    %209 = arith.addf %201, %208 : vector<4x128xf32>
    %c9_232 = arith.constant 9 : index
    %c0_233 = arith.constant 0 : index
    %210 = vector.load %arg13[%c9_232, %c0_233] : memref<32x128xf32, #tpu.memory_space<vmem>>, vector<4x128xf32>
    %cst_234 = arith.constant 0.000000e+00 : f32
    %211 = vector.broadcast %cst_234 : f32 to vector<4x128xf32>
    %212 = arith.maximumf %210, %211 : vector<4x128xf32>
    %c1_235 = arith.constant 1 : index
    %c1_236 = arith.constant 1 : index
    %c2_237 = arith.constant 2 : index
    %c0_238 = arith.constant 0 : index
    %c0_239 = arith.constant 0 : index
    %213 = vector.load %arg6[%c1_235, %c1_236, %c2_237, %c0_238, %c0_239] : memref<2x2x3x128x128xbf16, #tpu.memory_space<vmem>>, vector<1x1x1x128x128xbf16>
    %214 = vector.shape_cast %213 : vector<1x1x1x128x128xbf16> to vector<128x128xbf16>
    %215 = arith.truncf %212 : vector<4x128xf32> to vector<4x128xbf16>
    %cst_240 = arith.constant dense<0.000000e+00> : vector<4x128xf32>
    %216 = tpu.matmul %215, %214, %cst_240 {dimension_numbers = #tpu.dot_dimension_numbers<[1], [0], [0], [1], [0, 0, 1, 1], [], []>} : vector<4x128xbf16>, vector<128x128xbf16>, vector<4x128xf32> -> vector<4x128xf32>
    %217 = arith.addf %209, %216 : vector<4x128xf32>
    %218 = vector.broadcast %194 : vector<1x128xf32> to vector<4x128xf32>
    %219 = arith.addf %217, %218 : vector<4x128xf32>
    %cst_241 = arith.constant 0.000000e+00 : f32
    %220 = vector.broadcast %cst_241 : f32 to vector<4x128xf32>
    %221 = arith.maximumf %219, %220 : vector<4x128xf32>
    %c1_242 = arith.constant 1 : index
    %c1_243 = arith.constant 1 : index
    %c0_244 = arith.constant 0 : index
    %c0_245 = arith.constant 0 : index
    %222 = vector.load %arg8[%c1_242, %c1_243, %c0_244, %c0_245] : memref<2x2x128x128xbf16, #tpu.memory_space<vmem>>, vector<1x1x128x128xbf16>
    %223 = vector.shape_cast %222 : vector<1x1x128x128xbf16> to vector<128x128xbf16>
    %224 = arith.truncf %221 : vector<4x128xf32> to vector<4x128xbf16>
    %cst_246 = arith.constant dense<0.000000e+00> : vector<4x128xf32>
    %225 = tpu.matmul %224, %223, %cst_246 {dimension_numbers = #tpu.dot_dimension_numbers<[1], [0], [0], [1], [0, 0, 1, 1], [], []>} : vector<4x128xbf16>, vector<128x128xbf16>, vector<4x128xf32> -> vector<4x128xf32>
    %c1_247 = arith.constant 1 : index
    %c1_248 = arith.constant 1 : index
    %c0_249 = arith.constant 0 : index
    %c0_250 = arith.constant 0 : index
    %226 = vector.load %arg9[%c1_247, %c1_248, %c0_249, %c0_250] : memref<2x2x1x128xf32, #tpu.memory_space<vmem>>, vector<1x1x1x128xf32>
    %227 = vector.shape_cast %226 : vector<1x1x1x128xf32> to vector<1x128xf32>
    %228 = vector.broadcast %227 : vector<1x128xf32> to vector<4x128xf32>
    %229 = arith.addf %225, %228 : vector<4x128xf32>
    %230 = arith.addf %229, %192 : vector<4x128xf32>
    %c8_251 = arith.constant 8 : index
    %c0_252 = arith.constant 0 : index
    %231 = vector.load %arg13[%c8_251, %c0_252] : memref<32x128xf32, #tpu.memory_space<vmem>>, vector<4x128xf32>
    tpu.vector_store %arg13[%c8_251, %c0_252], %230 {strides = array<i32>} : memref<32x128xf32, #tpu.memory_space<vmem>>, vector<4x128xf32>,
    %c0_253 = arith.constant 0 : index
    %c0_254 = arith.constant 0 : index
    %232 = vector.load %arg11[%c0_253, %c0_254] : memref<1x128xf32, #tpu.memory_space<vmem>>, vector<1x128xf32>
    %c7_255 = arith.constant 7 : index
    %c0_256 = arith.constant 0 : index
    %233 = vector.load %arg13[%c7_255, %c0_256] : memref<32x128xf32, #tpu.memory_space<vmem>>, vector<4x128xf32>
    %c0_257 = arith.constant 0 : index
    %c0_258 = arith.constant 0 : index
    %c0_259 = arith.constant 0 : index
    %234 = vector.load %arg10[%c0_257, %c0_258, %c0_259] : memref<3x128x128xbf16, #tpu.memory_space<vmem>>, vector<1x128x128xbf16>
    %235 = vector.shape_cast %234 : vector<1x128x128xbf16> to vector<128x128xbf16>
    %236 = arith.truncf %233 : vector<4x128xf32> to vector<4x128xbf16>
    %cst_260 = arith.constant dense<0.000000e+00> : vector<4x128xf32>
    %237 = tpu.matmul %236, %235, %cst_260 {dimension_numbers = #tpu.dot_dimension_numbers<[1], [0], [0], [1], [0, 0, 1, 1], [], []>} : vector<4x128xbf16>, vector<128x128xbf16>, vector<4x128xf32> -> vector<4x128xf32>
    %c8_261 = arith.constant 8 : index
    %c0_262 = arith.constant 0 : index
    %238 = vector.load %arg13[%c8_261, %c0_262] : memref<32x128xf32, #tpu.memory_space<vmem>>, vector<4x128xf32>
    %c1_263 = arith.constant 1 : index
    %c0_264 = arith.constant 0 : index
    %c0_265 = arith.constant 0 : index
    %239 = vector.load %arg10[%c1_263, %c0_264, %c0_265] : memref<3x128x128xbf16, #tpu.memory_space<vmem>>, vector<1x128x128xbf16>
    %240 = vector.shape_cast %239 : vector<1x128x128xbf16> to vector<128x128xbf16>
    %241 = arith.truncf %238 : vector<4x128xf32> to vector<4x128xbf16>
    %cst_266 = arith.constant dense<0.000000e+00> : vector<4x128xf32>
    %242 = tpu.matmul %241, %240, %cst_266 {dimension_numbers = #tpu.dot_dimension_numbers<[1], [0], [0], [1], [0, 0, 1, 1], [], []>} : vector<4x128xbf16>, vector<128x128xbf16>, vector<4x128xf32> -> vector<4x128xf32>
    %243 = arith.addf %237, %242 : vector<4x128xf32>
    %c9_267 = arith.constant 9 : index
    %c0_268 = arith.constant 0 : index
    %244 = vector.load %arg13[%c9_267, %c0_268] : memref<32x128xf32, #tpu.memory_space<vmem>>, vector<4x128xf32>
    %c2_269 = arith.constant 2 : index
    %c0_270 = arith.constant 0 : index
    %c0_271 = arith.constant 0 : index
    %245 = vector.load %arg10[%c2_269, %c0_270, %c0_271] : memref<3x128x128xbf16, #tpu.memory_space<vmem>>, vector<1x128x128xbf16>
    %246 = vector.shape_cast %245 : vector<1x128x128xbf16> to vector<128x128xbf16>
    %247 = arith.truncf %244 : vector<4x128xf32> to vector<4x128xbf16>
    %cst_272 = arith.constant dense<0.000000e+00> : vector<4x128xf32>
    %248 = tpu.matmul %247, %246, %cst_272 {dimension_numbers = #tpu.dot_dimension_numbers<[1], [0], [0], [1], [0, 0, 1, 1], [], []>} : vector<4x128xbf16>, vector<128x128xbf16>, vector<4x128xf32> -> vector<4x128xf32>
    %249 = arith.addf %243, %248 : vector<4x128xf32>
    %250 = vector.broadcast %232 : vector<1x128xf32> to vector<4x128xf32>
    %251 = arith.addf %249, %250 : vector<4x128xf32>
    %c0_273 = arith.constant 0 : index
    %c0_274 = arith.constant 0 : index
    %c0_275 = arith.constant 0 : index
    %252 = vector.load %arg12[%c0_273, %c0_274, %c0_275] : memref<1x4x128xf32, #tpu.memory_space<vmem>>, vector<1x4x128xf32>
    %253 = vector.shape_cast %252 : vector<1x4x128xf32> to vector<4x128xf32>
    %254 = vector.shape_cast %251 : vector<4x128xf32> to vector<1x4x128xf32>
    tpu.vector_store %arg12[%c0_273, %c0_274, %c0_275], %254 {strides = array<i32>} : memref<1x4x128xf32, #tpu.memory_space<vmem>>, vector<1x4x128xf32>,
    return
  }
  func.func @transform_0(%arg0: i32) -> (i32, i32, i32) {
    %c0_i32 = arith.constant 0 : i32
    %c0_i32_0 = arith.constant 0 : i32
    %c0_i32_1 = arith.constant 0 : i32
    return %arg0, %c0_i32, %c0_i32_0 : i32, i32, i32
  }
  func.func @transform_1(%arg0: i32) -> (i32, i32) {
    %c0_i32 = arith.constant 0 : i32
    %c0_i32_0 = arith.constant 0 : i32
    %c0_i32_1 = arith.constant 0 : i32
    return %c0_i32, %c0_i32_0 : i32, i32
  }
  func.func @transform_2(%arg0: i32) -> (i32, i32) {
    %c0_i32 = arith.constant 0 : i32
    %c0_i32_0 = arith.constant 0 : i32
    %c0_i32_1 = arith.constant 0 : i32
    return %c0_i32, %c0_i32_0 : i32, i32
  }
  func.func @transform_3(%arg0: i32) -> (i32, i32, i32, i32) {
    %c0_i32 = arith.constant 0 : i32
    %c0_i32_0 = arith.constant 0 : i32
    %c0_i32_1 = arith.constant 0 : i32
    %c0_i32_2 = arith.constant 0 : i32
    %c0_i32_3 = arith.constant 0 : i32
    return %c0_i32, %c0_i32_0, %c0_i32_1, %c0_i32_2 : i32, i32, i32, i32
  }
  func.func @transform_4(%arg0: i32) -> (i32, i32, i32) {
    %c0_i32 = arith.constant 0 : i32
    %c0_i32_0 = arith.constant 0 : i32
    %c0_i32_1 = arith.constant 0 : i32
    %c0_i32_2 = arith.constant 0 : i32
    return %c0_i32, %c0_i32_0, %c0_i32_1 : i32, i32, i32
  }
  func.func @transform_5(%arg0: i32) -> (i32, i32, i32, i32, i32) {
    %c0_i32 = arith.constant 0 : i32
    %c0_i32_0 = arith.constant 0 : i32
    %c0_i32_1 = arith.constant 0 : i32
    %c0_i32_2 = arith.constant 0 : i32
    %c0_i32_3 = arith.constant 0 : i32
    %c0_i32_4 = arith.constant 0 : i32
    return %c0_i32, %c0_i32_0, %c0_i32_1, %c0_i32_2, %c0_i32_3 : i32, i32, i32, i32, i32
  }
  func.func @transform_6(%arg0: i32) -> (i32, i32, i32, i32) {
    %c0_i32 = arith.constant 0 : i32
    %c0_i32_0 = arith.constant 0 : i32
    %c0_i32_1 = arith.constant 0 : i32
    %c0_i32_2 = arith.constant 0 : i32
    %c0_i32_3 = arith.constant 0 : i32
    return %c0_i32, %c0_i32_0, %c0_i32_1, %c0_i32_2 : i32, i32, i32, i32
  }
  func.func @transform_7(%arg0: i32) -> (i32, i32, i32, i32) {
    %c0_i32 = arith.constant 0 : i32
    %c0_i32_0 = arith.constant 0 : i32
    %c0_i32_1 = arith.constant 0 : i32
    %c0_i32_2 = arith.constant 0 : i32
    %c0_i32_3 = arith.constant 0 : i32
    return %c0_i32, %c0_i32_0, %c0_i32_1, %c0_i32_2 : i32, i32, i32, i32
  }
  func.func @transform_8(%arg0: i32) -> (i32, i32, i32, i32) {
    %c0_i32 = arith.constant 0 : i32
    %c0_i32_0 = arith.constant 0 : i32
    %c0_i32_1 = arith.constant 0 : i32
    %c0_i32_2 = arith.constant 0 : i32
    %c0_i32_3 = arith.constant 0 : i32
    return %c0_i32, %c0_i32_0, %c0_i32_1, %c0_i32_2 : i32, i32, i32, i32
  }
  func.func @transform_9(%arg0: i32) -> (i32, i32, i32) {
    %c0_i32 = arith.constant 0 : i32
    %c0_i32_0 = arith.constant 0 : i32
    %c0_i32_1 = arith.constant 0 : i32
    %c0_i32_2 = arith.constant 0 : i32
    return %c0_i32, %c0_i32_0, %c0_i32_1 : i32, i32, i32
  }
  func.func @transform_10(%arg0: i32) -> (i32, i32) {
    %c0_i32 = arith.constant 0 : i32
    %c0_i32_0 = arith.constant 0 : i32
    %c0_i32_1 = arith.constant 0 : i32
    return %c0_i32, %c0_i32_0 : i32, i32
  }
  func.func @transform_11(%arg0: i32) -> (i32, i32, i32) {
    %c0_i32 = arith.constant 0 : i32
    %c0_i32_0 = arith.constant 0 : i32
    %c0_i32_1 = arith.constant 0 : i32
    return %arg0, %c0_i32, %c0_i32_0 : i32, i32, i32
  }
}

</mosaic_0001>

<bundles_post_ra>
// kernel: tpu_custom_call.1
= control target key start
LH: loop header
LB: loop body
LE: loop exit
PB: predicated region body
PF: predicated region fallthrough
CT: control target
= control target key end

     0   :  { %s4964_s0 = inlined_call_operand.hbm [shape: bf16[2,16,128], index: 0, kind: input, shape index: {}]   ;;  %s4965_s1 = inlined_call_operand.hbm [shape: bf16[128,128], index: 1, kind: input, shape index: {}]   ;;  %s4966_s2 = inlined_call_operand.vmem [shape: f32[1,128], index: 2, kind: input, shape index: {}]   ;;  %s4967_s3 = inlined_call_operand.hbm [shape: bf16[2,4,128,128], index: 3, kind: input, shape index: {}]   ;;  %s4968_s4 = inlined_call_operand.hbm [shape: f32[2,1,128], index: 4, kind: input, shape index: {}]   ;;  %s4969_s5 = inlined_call_operand.hbm [shape: bf16[2,2,3,128,128], index: 5, kind: input, shape index: {}]   ;;  %s4970_s6 = inlined_call_operand.vmem [shape: f32[2,2,1,128], index: 6, kind: input, shape index: {}]   ;;  %s4971_s7 = inlined_call_operand.hbm [shape: bf16[2,2,128,128], index: 7, kind: input, shape index: {}]   ;;  %s4972_s8 = inlined_call_operand.hbm [shape: f32[2,2,1,128], index: 8, kind: input, shape index: {}]   ;;  %s4973_s9 = inlined_call_operand.hbm [shape: bf16[3,128,128], index: 9, kind: input, shape index: {}]   ;;  %s4974_s10 = inlined_call_operand.vmem [shape: f32[1,128], index: 10, kind: input, shape index: {}]   ;;  %s4975_s11 = inlined_call_operand.hbm [shape: f32[2,4,128], index: 11, kind: output, shape index: {}]  }
   0x1   :  { %4979 = sst [smem:[#allocation24_spill]] %s4965_s1 }
   0x2   :  { %4980 = sst [smem:[#allocation25_spill]] %s4967_s3 }
   0x3   :  { %4981 = sst [smem:[#allocation26_spill]] %s4968_s4 }
   0x4   :  { %4982 = sst [smem:[#allocation27_spill]] %s4969_s5 }
   0x5   :  { %4983 = sst [smem:[#allocation28_spill]] %s4971_s7 }
   0x6   :  { %16 = vsyncpa [#allocation4], 0 }
   0x7   :  { %18 = vsyncpa [#allocation4 + $0x1], 0 }
   0x8   :  { %19 = vsyncpa [#allocation7], 0 }
   0x9   :  { %20 = vsyncpa [#allocation10], 0 }
   0xa   :  { %21 = vsyncpa [#allocation13], 0 }
   0xb   :  { %22 = vsyncpa [#allocation16], 0 }
   0xc   :  { %23 = vsyncpa [#allocation5], 0 }
   0xd   :  { %25 = vsyncpa [#allocation5 + $0x1], 0  ;;  %s4712_s17 = smov 0   ;;  %s4714_s18 = smov 0  }
   0xe   :  { %s4716_s19 = smov 0   ;;  %s4718_s20 = smov 0  }
   0xf LB: > { %s4984_s1 = sld [smem:[#allocation24_spill]]  ;;  %s4736_s24 = sadd.s32 4294967295, %s4638_s20   ;;  %s4638_s20 = sphi %s4718_s20, %s5002_s20   ;;  %s4634_s19 = sphi %s4716_s19, %s5001_s19   ;;  %s4630_s18 = sphi %s4714_s18, %s5000_s18   ;;  %s4626_s17 = sphi %s4712_s17, %s4999_s17  }
  0x10   : > { %p3027_p0 = scmp.ge.s32.totalorder %s4638_s20, 1  ;;  %p52_p1 = scmp.eq.s32.totalorder %s4736_s24, 0 }
  0x11   : > { %p298_p2 = scmp.lt.s32.totalorder %s4638_s20, 3  ;;  %s4640_s26 = smov [#allocation6]  }
  0x12   : > { %s311_s27 = sshll.u32 %s4640_s26, 4  ;;  %s4986_s4 = sld [smem:[#allocation26_spill]]  ;;  %s312_s27 = int_to_ptr.vmem [resolvable:$true] %s311_s27 }
  0x13   : > { %p4741_p3 = pnand %p3027_p0, %p298_p2  ;;  %s4641_s13 = smov [#allocation9]  }
  0x14   : > { %s342_s14 = sshll.u32 %s4641_s13, 4  ;;  %s4977_s15 = smov 64   ;;  %s343_s14 = int_to_ptr.vmem [resolvable:$true] %s342_s14 }
  0x15   : > { %s309_s23 = sshll.u32 %s4984_s1, 4  ;;  %p4214_p4 = pneg %p4741_p3  ;;  %s310_s23 = int_to_ptr.hbm [resolvable:$true] %s309_s23 }
  0x16   : > { %s4978_s16 = smov 4   ;;  %s4976_s21 = smov 16  }
  0x17   : > { %p4753_p6 = pnand %p4214_p4, %p52_p1  ;;  %s4645_s22 = smov 1  }
  0x18   : > { %s340_s30 = sshll.u32 %s4986_s4, 4  ;;  %s4988_s7 = sld [smem:[#allocation28_spill]]  ;;  %s341_s30 = int_to_ptr.hbm [resolvable:$true] %s340_s30 }
  0x19   : > { %4217 = dma.hbm_to_vmem [thread:$0]  (!%p4753_p6), %s310_s23, 1024, %s312_s27, [#allocation7], %s4977_s15, %s4977_s15, %s4978_s16  }
  0x1a   : > { %4223 = dma.hbm_to_vmem [thread:$0]  (!%p4753_p6), %s341_s30, 32, %s343_s14, [#allocation10], %s4976_s21, %s4976_s21, %s4645_s22  }
  0x1b   : > { %s4646_s13 = smov [#allocation12]   ;;  %s4989_s3 = sld [smem:[#allocation25_spill]] }
  0x1c   : > { %s373_s1 = sshll.u32 %s4646_s13, 4  ;;  %s4647_s30 = smov [#allocation8]   ;;  %s374_s1 = int_to_ptr.vmem [resolvable:$true] %s373_s1 }
  0x1d   : > { %s328_s14 = sshll.u32 %s4647_s30, 4  ;;  %s4990_s5 = sld [smem:[#allocation27_spill]]  ;;  %s329_s14 = int_to_ptr.vmem [resolvable:$true] %s328_s14 }
  0x1e   : > { %s371_s29 = sshll.u32 %s4988_s7, 4  ;;  %s4649_s21 = smov [#allocation14]   ;;  %s372_s29 = int_to_ptr.hbm [resolvable:$true] %s371_s29 }
  0x1f   : > { %4229 = dma.hbm_to_vmem [thread:$0]  (!%p4753_p6), %s372_s29, 4096, %s374_s1, [#allocation13], %s4977_s15, %s4977_s15, %s4978_s16  }
  0x20   : > { %s385_s1 = sshll.u32 %s4972_s8, 4  ;;  %s4648_s29 = smov [#allocation11]   ;;  %s386_s1 = int_to_ptr.hbm [resolvable:$true] %s385_s1 }
  0x21   : > { %s326_s27 = sshll.u32 %s4989_s3, 4  ;;  %s356_s23 = sshll.u32 %s4648_s29, 4  ;;  %s327_s27 = int_to_ptr.hbm [resolvable:$true] %s326_s27  ;;  %s357_s23 = int_to_ptr.vmem [resolvable:$true] %s356_s23 }
  0x22   : > { %4220 = dma.hbm_to_vmem [thread:$0]  (!%p4753_p6), %s327_s27, 8192, %s329_s14, [#allocation7], %s4977_s15, %s4977_s15, %s4978_s16  }
  0x23   : > { %s354_s28 = sshll.u32 %s4990_s5, 4  ;;  %s387_s27 = sshll.u32 %s4649_s21, 4  ;;  %s355_s28 = int_to_ptr.hbm [resolvable:$true] %s354_s28  ;;  %s388_s27 = int_to_ptr.vmem [resolvable:$true] %s387_s27 }
  0x24   : > { %4226 = dma.hbm_to_vmem [thread:$0]  (!%p4753_p6), %s355_s28, 12288, %s357_s23, [#allocation10], %s4977_s15, %s4977_s15, %s4978_s16  }
  0x25   : > { %s399_s26 = sshll.u32 %s4973_s9, 4  ;;  %s4991_s4 = smov 16   ;;  %s400_s26 = int_to_ptr.hbm [resolvable:$true] %s399_s26 }
  0x26   : > { %4232 = dma.hbm_to_vmem [thread:$0]  (!%p4753_p6), %s386_s1, 64, %s388_s27, [#allocation13], %s4991_s4, %s4991_s4, %s4645_s22  }
  0x27   : > { %s4650_s28 = smov [#allocation15]   ;;  %s3026_s29 = sadd.s32 4294967294, %s4638_s20  }
  0x28   : > { %s401_s13 = sshll.u32 %s4650_s28, 4  ;;  %s4809_s23 = sadd.s32 1, %s4638_s20   ;;  %s402_s13 = int_to_ptr.vmem [resolvable:$true] %s401_s13 }
  0x29   : > { %4235 = dma.hbm_to_vmem [thread:$0]  (!%p4753_p6), %s400_s26, 3072, %s402_s13, [#allocation16], %s4977_s15, %s4977_s15, %s4978_s16  }
  0x2a   : > { %s38_s21 = sadd.s32 1, %s4634_s19  ;;  %s35_s30 = ssub.s32 %s4638_s20, %s4809_s23 }
  0x2b   : > { %p45_p7 = scmp.ne.s32.totalorder %s4634_s19, %s4630_s18  ;;  %p36_p8 = scmp.eq.s32.totalorder %s35_s30, 0 }
  0x2c   : > { %p46_p9 = scmp.eq.s32.totalorder %s4638_s20, 0  ;;  %p51_p10 = scmp.ne.s32.totalorder %s4630_s18, %s4626_s17 }
  0x2d   : > { %p285_p11 = scmp.eq.s32.totalorder %s4736_s24, 1  ;;  %p291_p0 = scmp.eq.s32.totalorder %s3026_s29, 1 }
  0x2e   : > { %s4821_s22 = scalar_select %p36_p8, %s4634_s19, %s38_s21  }
  0x2f   : > { %p4825_p12 = por %p52_p1, %p51_p10  ;;  %p4829_p13 = por %p285_p11, %p45_p7 }
  0x30   : > { %p47_p2 = por %p46_p9, %p45_p7  ;;  %s418_s27 = sand.u32 1, %s4634_s19  }
  0x31   : > { %p4834_p4 = por %p291_p0, %p51_p10  ;;  %p4251_p6 = scmp.lt.s32.totalorder %s4638_s20, 2 }
  0x32   : > { %s3036_s26 = sshll.u32 %s418_s27, 3  ;;  %s3956_s4 = sshll.u32 %s4638_s20, 3 }
  0x33   : > { %s427_s21 = scalar_lea.hbm %s4964_s0, %s3956_s4  ;;  %s422_s15 = scalar_lea.vmem [#allocation3], %s3036_s26 }
  0x34   : > { %s428_s30 = sshll.u32 %s427_s21, 4  ;;  %s430_s16 = sshll.u32 %s422_s15, 4  ;;  %s429_s30 = int_to_ptr.hbm [resolvable:$true] %s428_s30  ;;  %s431_s16 = int_to_ptr.vmem [resolvable:$true] %s430_s16 }
  0x35   : > { %p4843_p8 = pnand %p4251_p6, %p47_p2  ;;  %s419_s3 = scalar_lea.sflag [#allocation4], %s418_s27 }
  0x36   : > { %s4526_s5 = sshra.s32 %s429_s30, 4  ;;  %s4533_s15 = scalar_lea.hbm %s4964_s0, 16  ;;  %s4527_s5 = int_to_ptr.hbm [resolvable:$true] %s4526_s5 }
  0x37   : > { %s4528_s7 = scalar_lea.hbm %s4527_s5, 8  ;;  %p4530_p9 = pneg %p4843_p8 }
  0x38   : > { %p4529_p7 = scmp.ne.s32.totalorder %s4527_s5, %s4528_s7  ;;  %p4534_p0 = scmp.lt.s32.totalorder %s4527_s5, %s4964_s0 }
  0x39   : > { %p4535_p2 = scmp.lt.s32.totalorder %s4533_s15, %s4528_s7 }
  0x3a   : > { %p4531_p10 = pnand %p4530_p9, %p4529_p7 }
  0x3b   : > { %p4536_p6 = por %p4535_p2, %p4534_p0 }
  0x3c   : > { %p4532_p11 = pneg %p4531_p10 }
  0x3e   : > { %p4537_p5 = pnand %p4536_p6, %p4532_p11 }
  0x40   : > { %4540 = shalt.err (!%p4537_p5)
}
  0x41   : > { %s4996_s27 = smov 4   ;;  %s4997_s21 = smov 64  }
  0x42   : > { %4239 = dma.hbm_to_vmem [thread:$0]  (!%p4843_p8), %s429_s30, 128, %s431_s16, %s419_s3, %s4997_s21, %s4997_s21, %s4996_s27  }
  0x43   : > { %442 = sbr.rel (%p4741_p3) target bundleno = 1842 (0x732), region = 64  ;;  %s4863_s4 = sand.u32 (!%p4741_p3), 1, %s4630_s18  }
  0x44   : > { %s3040_s5 = sshll.u32 (!%p4741_p3), %s4863_s4, 3  ;;  %s445_s7 = scalar_lea.sflag (!%p4741_p3), [#allocation4], %s4863_s4 }
  0x45   : > { %s4867_s28 = scalar_lea.vmem (!%p4741_p3), [#allocation3], %s3040_s5 }
  0x48   : > { %4601 = dma.done.wait (%p4825_p12), %s445_s7, 128  }
  0x49   : > { %4603 = vsyncadd (%p4825_p12), %s445_s7, 4294967168 }
  0x4a   : > { %4605 = dma.done.wait (%p52_p1), [#allocation7], 9216  }
  0x4b   : > { %4607 = vsyncadd (%p52_p1), [#allocation7], 4294958080 }
  0x4c   : > { %4609 = dma.done.wait (%p52_p1), [#allocation10], 12320  }
  0x4d   : > { %4611 = vsyncadd (%p52_p1), [#allocation10], 4294954976 }
  0x4e   : > { %4613 = dma.done.wait (%p52_p1), [#allocation13], 4160  }
  0x4f   : > { %4615 = vsyncadd (%p52_p1), [#allocation13], 4294963136 }
  0x50   : > { %4617 = dma.done.wait (%p52_p1), [#allocation16], 3072  }
  0x51   : > { %4619 = vsyncadd (%p52_p1), [#allocation16], 4294964224  ;;  %v3965_v0 = vld [vmem:[#allocation6 + $0x38] sm:$0xff]  ;;  %v3964_v1 = vld [vmem:[#allocation6 + $0x30] sm:$0xff]  ;;  %v4651_v6 = vmov 0.0   ;;  %s3048_s21 = sshll.u32 %s4863_s4, 2 }
  0x52   : > { %603 = vmatpush.bf16.msra.mxu0 %v3965_v0  ;;  %v3981_v2 = vld [vmem:[#allocation8 + $0x78] sm:$0xff]  ;;  %v3963_v5 = vld [vmem:[#allocation6 + $0x28] sm:$0xff]  ;;  %523 = vst [vmem:[#allocation2] sm:$0xff] %v4651_v6  ;;  %v3980_v7 = vld [vmem:[#allocation8 + $0x70] sm:$0xff]  ;;  %s3953_s5 = sshll.u32 %s4736_s24, 2  ;;  %s522_s12 = scalar_lea.vmem [#allocation17], %s3048_s21 }
  0x53   : > { %v3973_v3 = vld [vmem:[#allocation8 + $0x38] sm:$0xff]  ;;  %708 = vmatpush.bf16.msra.mxu1 %v3981_v2  ;;  %v3972_v8 = vld [vmem:[#allocation8 + $0x30] sm:$0xff]  ;;  %526 = vst [vmem:[#allocation2 + $0x18] sm:$0xff] %v4651_v6  ;;  %v3962_v10 = vld [vmem:[#allocation6 + $0x20] sm:$0xff]  ;;  %s2884_s3 = scalar_lea.hbm %s4975_s11, %s3953_s5  ;;  %s2886_s30 = sshll.u32 %s522_s12, 4  ;;  %s2887_s30 = int_to_ptr.vmem [resolvable:$true] %s2886_s30 }
  0x54   : > { %v3989_v4 = vld [vmem:[#allocation8 + $0xb8] sm:$0xff]  ;;  %769 = vmatpush.bf16.msra.mxu2 %v3973_v3  ;;  %v3988_v9 = vld [vmem:[#allocation8 + $0xb0] sm:$0xff]  ;;  %v3959_v13 = vld [vmem:[#allocation6 + $0x8] sm:$0xff]  ;;  %s2888_s29 = sshll.u32 %s2884_s3, 4  ;;  %s2874_s24 = scalar_lea.sflag [#allocation5], %s4863_s4  ;;  %s2889_s29 = int_to_ptr.hbm [resolvable:$true] %s2888_s29 }
  0x55   : > { %850 = vmatpush.bf16.msra.mxu3 %v3989_v4  ;;  %v3961_v11 = vld [vmem:[#allocation6 + $0x18] sm:$0xff]  ;;  %v3960_v12 = vld [vmem:[#allocation6 + $0x10] sm:$0xff]  ;;  %v3958_v14 = vld [vmem:[#allocation6] sm:$0xff]  ;;  %s4570_s15 = sshra.s32 %s2889_s29, 4  ;;  %s4576_s21 = scalar_lea.hbm %s4975_s11, 8  ;;  %s4571_s15 = int_to_ptr.hbm [resolvable:$true] %s4570_s15 }
  0x56   : > { %604 = vmatpush.bf16.msra.mxu0 %v3964_v1  ;;  %v3997_v15 = vld [vmem:[#allocation8 + $0xf8] sm:$0xff]  ;;  %v3996_v17 = vld [vmem:[#allocation8 + $0xf0] sm:$0xff]  ;;  %v3979_v18 = vld [vmem:[#allocation8 + $0x68] sm:$0xff]  ;;  %s4572_s26 = scalar_lea.hbm %s4571_s15, 4  ;;  %p4577_p12 = scmp.lt.s32.totalorder %s4571_s15, %s4975_s11 }
  0x57   : > { %709 = vmatpush.bf16.msra.mxu1 %v3980_v7  ;;  %v3957_v16 = vld [vmem:[%s4867_s28] sm:$0xff]  ;;  %v3971_v19 = vld [vmem:[#allocation8 + $0x28] sm:$0xff]  ;;  %v3978_v22 = vld [vmem:[#allocation8 + $0x60] sm:$0xff]  ;;  %p4573_p1 = scmp.ne.s32.totalorder %s4571_s15, %s4572_s26  ;;  %p4578_p8 = scmp.lt.s32.totalorder %s4576_s21, %s4572_s26 }
  0x58   : > { %770 = vmatpush.bf16.msra.mxu2 %v3972_v8  ;;  %v3987_v20 = vld [vmem:[#allocation8 + $0xa8] sm:$0xff]  ;;  %v3970_v23 = vld [vmem:[#allocation8 + $0x20] sm:$0xff]  ;;  %v3977_v26 = vld [vmem:[#allocation8 + $0x58] sm:$0xff] }
  0x59   : > { %851 = vmatpush.bf16.msra.mxu3 %v3988_v9  ;;  %v3995_v21 = vld [vmem:[#allocation8 + $0xe8] sm:$0xff]  ;;  %v3986_v24 = vld [vmem:[#allocation8 + $0xa0] sm:$0xff]  ;;  %v3969_v27 = vld [vmem:[#allocation8 + $0x18] sm:$0xff]  ;;  %p4574_p3 = pnand %p4573_p1, %p4829_p13  ;;  %p4579_p7 = por %p4578_p8, %p4577_p12 }
  0x5a   : > { %605 = vmatpush.bf16.msra.mxu0 %v3963_v5  ;;  %v3994_v25 = vld [vmem:[#allocation8 + $0xe0] sm:$0xff]  ;;  %v3985_v28 = vld [vmem:[#allocation8 + $0x98] sm:$0xff]  ;;  %v3976_v30 = vld [vmem:[#allocation8 + $0x50] sm:$0xff] }
  0x5b   : > { %710 = vmatpush.bf16.msra.mxu1 %v3979_v18  ;;  %v3993_v29 = vld [vmem:[#allocation8 + $0xd8] sm:$0xff]  ;;  %v3968_v31 = vld [vmem:[#allocation8 + $0x10] sm:$0xff]  ;;  %v3975_v34 = vld [vmem:[#allocation8 + $0x48] sm:$0xff]  ;;  %p4575_p5 = pneg %p4574_p3 }
  0x5c   : > { %771 = vmatpush.bf16.msra.mxu2 %v3971_v19  ;;  %v3984_v32 = vld [vmem:[#allocation8 + $0x90] sm:$0xff]  ;;  %v3967_v35 = vld [vmem:[#allocation8 + $0x8] sm:$0xff]  ;;  %v3974_v38 = vld [vmem:[#allocation8 + $0x40] sm:$0xff] }
  0x5d   : > { %852 = vmatpush.bf16.msra.mxu3 %v3987_v20  ;;  %v3992_v33 = vld [vmem:[#allocation8 + $0xd0] sm:$0xff]  ;;  %v3983_v36 = vld [vmem:[#allocation8 + $0x88] sm:$0xff]  ;;  %v3966_v39 = vld [vmem:[#allocation8] sm:$0xff]  ;;  %p4580_p9 = pnand %p4579_p7, %p4575_p5 }
  0x5e   : > { %606 = vmatpush.bf16.msra.mxu0 %v3962_v10  ;;  %v3991_v37 = vld [vmem:[#allocation8 + $0xc8] sm:$0xff]  ;;  %v3982_v40 = vld [vmem:[#allocation8 + $0x80] sm:$0xff]  ;;  %v4304_v45 = vld [vmem:[%s4966_s2] ss:$0 sm:$0xff] }
  0x5f   : > { %711 = vmatpush.bf16.msra.mxu1 %v3978_v22  ;;  %v3990_v41 = vld [vmem:[#allocation8 + $0xc0] sm:$0xff]  ;;  %v4012_v60 = vld [vmem:[#allocation11 + $0x70] sm:$0xff]  ;;  %v4011_v61 = vld [vmem:[#allocation11 + $0x68] sm:$0xff] }
  0x60   : > { %772 = vmatpush.bf16.msra.mxu2 %v3970_v23  ;;  %v4013_v42 = vld [vmem:[#allocation11 + $0x78] sm:$0xff]  ;;  %v4004_v62 = vld [vmem:[#allocation11 + $0x30] sm:$0xff]  ;;  %v4010_v0 = vld [vmem:[#allocation11 + $0x60] sm:$0xff] }
  0x61   : > { %853 = vmatpush.bf16.msra.mxu3 %v3986_v24  ;;  %v4005_v43 = vld [vmem:[#allocation11 + $0x38] sm:$0xff]  ;;  %v4020_v63 = vld [vmem:[#allocation11 + $0xb0] sm:$0xff]  ;;  %v4003_v1 = vld [vmem:[#allocation11 + $0x28] sm:$0xff] }
  0x62   : > { %607 = vmatpush.bf16.msra.mxu0 %v3961_v11  ;;  %v4021_v44 = vld [vmem:[#allocation11 + $0xb8] sm:$0xff]  ;;  %v4019_v2 = vld [vmem:[#allocation11 + $0xa8] sm:$0xff]  ;;  %v4002_v4 = vld [vmem:[#allocation11 + $0x20] sm:$0xff] }
  0x63   : > { %712 = vmatpush.bf16.msra.mxu1 %v3977_v26  ;;  %v4009_v3 = vld [vmem:[#allocation11 + $0x58] sm:$0xff]  ;;  %v4018_v5 = vld [vmem:[#allocation11 + $0xa0] sm:$0xff]  ;;  %v4008_v7 = vld [vmem:[#allocation11 + $0x50] sm:$0xff] }
  0x64   : > { %773 = vmatpush.bf16.msra.mxu2 %v3969_v27  ;;  %v4001_v8 = vld [vmem:[#allocation11 + $0x18] sm:$0xff]  ;;  %v4007_v10 = vld [vmem:[#allocation11 + $0x48] sm:$0xff]  ;;  %v4000_v11 = vld [vmem:[#allocation11 + $0x10] sm:$0xff] }
  0x65   : > { %854 = vmatpush.bf16.msra.mxu3 %v3985_v28  ;;  %v4017_v9 = vld [vmem:[#allocation11 + $0x98] sm:$0xff]  ;;  %v4028_v19 = vld [vmem:[#allocation12 + $0x30] sm:$0xff]  ;;  %v4027_v22 = vld [vmem:[#allocation12 + $0x28] sm:$0xff] }
  0x66   : > { %608 = vmatpush.bf16.msra.mxu0 %v3960_v12  ;;  %v4016_v12 = vld [vmem:[#allocation11 + $0x90] sm:$0xff]  ;;  %v4029_v18 = vld [vmem:[#allocation12 + $0x38] sm:$0xff]  ;;  %v4026_v23 = vld [vmem:[#allocation12 + $0x20] sm:$0xff] }
  0x67   : > { %713 = vmatpush.bf16.msra.mxu1 %v3976_v30 }
  0x68   : > { %774 = vmatpush.bf16.msra.mxu2 %v3968_v31 }
  0x69   : > { %855 = vmatpush.bf16.msra.mxu3 %v3984_v32 }
  0x6a   : > { %609 = vmatpush.bf16.msra.mxu0 %v3959_v13  ;;  %v4006_v13 = vld [vmem:[#allocation11 + $0x40] sm:$0xff] }
  0x6b   : > { %714 = vmatpush.bf16.msra.mxu1 %v3975_v34 }
  0x6c   : > { %775 = vmatpush.bf16.msra.mxu2 %v3967_v35 }
  0x6d   : > { %856 = vmatpush.bf16.msra.mxu3 %v3983_v36 }
  0x6e   : > { %610 = vmatpush.bf16.msra.mxu0 %v3958_v14  ;;  %v3999_v14 = vld [vmem:[#allocation11 + $0x8] sm:$0xff] }
  0x6f   : > { %715 = vmatpush.bf16.msra.mxu1 %v3974_v38 }
  0x70   : > { %776 = vmatpush.bf16.msra.mxu2 %v3966_v39 }
  0x71   : > { %611 = vmatmul.bf16.vlgmr.msra.gmra.mxu0 %v3957_v16  ;;  %857 = vmatpush.bf16.msra.mxu3 %v3982_v40  ;;  %v3998_v16 = vld [vmem:[#allocation11] sm:$0xff] }
  0x72   : > { %932 = vmatpush.bf16.msrb.mxu0 %v3997_v15  ;;  %v4015_v15 = vld [vmem:[#allocation11 + $0x88] sm:$0xff] }
  0x73   : > { %1041 = vmatpush.bf16.msrb.mxu1 %v4013_v42 }
  0x74   : > { %1102 = vmatpush.bf16.msrb.mxu2 %v4005_v43  ;;  %v4025_v43 = vld [vmem:[#allocation12 + $0x18] sm:$0xff] }
  0x75   : > { %1183 = vmatpush.bf16.msrb.mxu3 %v4021_v44  ;;  %v4024_v44 = vld [vmem:[#allocation12 + $0x10] sm:$0xff] }
  0x76   : > { %933 = vmatpush.bf16.msrb.mxu0 %v3996_v17  ;;  %v4014_v17 = vld [vmem:[#allocation11 + $0x80] sm:$0xff] }
  0x77   : > { %1042 = vmatpush.bf16.msrb.mxu1 %v4012_v60 }
  0x78   : > { %1103 = vmatpush.bf16.msrb.mxu2 %v4004_v62 }
  0x79   : > { %1184 = vmatpush.bf16.msrb.mxu3 %v4020_v63 }
  0x7a   : > { %934 = vmatpush.bf16.msrb.mxu0 %v3995_v21 }
  0x7b   : > { %1043 = vmatpush.bf16.msrb.mxu1 %v4011_v61 }
  0x7c   : > { %1104 = vmatpush.bf16.msrb.mxu2 %v4003_v1 }
  0x7d   : > { %1185 = vmatpush.bf16.msrb.mxu3 %v4019_v2 }
  0x7e   : > { %935 = vmatpush.bf16.msrb.mxu0 %v3994_v25 }
  0x7f   : > { %1044 = vmatpush.bf16.msrb.mxu1 %v4010_v0  ;;  %v4306_v0 = vld [vmem:[%s4970_s6] ss:$0 sm:$0xff] }
  0x80   : > { %1105 = vmatpush.bf16.msrb.mxu2 %v4002_v4 }
  0x81   : > { %1186 = vmatpush.bf16.msrb.mxu3 %v4018_v5 }
  0x82   : > { %936 = vmatpush.bf16.msrb.mxu0 %v3993_v29  ;;  %v4305_v29 = vld [vmem:[#allocation9] ss:$0 sm:$0xff] }
  0x83   : > { %1045 = vmatpush.bf16.msrb.mxu1 %v4009_v3 }
  0x84   : > { %1106 = vmatpush.bf16.msrb.mxu2 %v4001_v8  ;;  %v4041_v8 = vld [vmem:[#allocation11 + $0x118] sm:$0xff] }
  0x85   : > { %1187 = vmatpush.bf16.msrb.mxu3 %v4017_v9  ;;  %v4040_v9 = vld [vmem:[#allocation11 + $0x110] sm:$0xff] }
  0x86   : > { %937 = vmatpush.bf16.msrb.mxu0 %v3992_v33 }
  0x87   : > { %1046 = vmatpush.bf16.msrb.mxu1 %v4008_v7 }
  0x88   : > { %1107 = vmatpush.bf16.msrb.mxu2 %v4000_v11  ;;  %v4049_v11 = vld [vmem:[#allocation11 + $0x158] sm:$0xff] }
  0x89   : > { %1188 = vmatpush.bf16.msrb.mxu3 %v4016_v12  ;;  %v4039_v12 = vld [vmem:[#allocation11 + $0x108] sm:$0xff] }
  0x8a   : > { %938 = vmatpush.bf16.msrb.mxu0 %v3991_v37 }
  0x8b   : > { %1047 = vmatpush.bf16.msrb.mxu1 %v4007_v10  ;;  %v4033_v10 = vld [vmem:[#allocation11 + $0xd8] sm:$0xff] }
  0x8c   : > { %1108 = vmatpush.bf16.msrb.mxu2 %v3999_v14  ;;  %v4048_v14 = vld [vmem:[#allocation11 + $0x150] sm:$0xff] }
  0x8d   : > { %1189 = vmatpush.bf16.msrb.mxu3 %v4015_v15  ;;  %v4038_v15 = vld [vmem:[#allocation11 + $0x100] sm:$0xff] }
  0x8e   : > { %939 = vmatpush.bf16.msrb.mxu0 %v3990_v41 }
  0x8f   : > { %1048 = vmatpush.bf16.msrb.mxu1 %v4006_v13  ;;  %v4032_v13 = vld [vmem:[#allocation11 + $0xd0] sm:$0xff] }
  0x90   : > { %1109 = vmatpush.bf16.msrb.mxu2 %v3998_v16  ;;  %v4031_v16 = vld [vmem:[#allocation11 + $0xc8] sm:$0xff] }
  0x91   : > { %1190 = vmatpush.bf16.msrb.mxu3 %v4014_v17  ;;  %v4047_v17 = vld [vmem:[#allocation11 + $0x148] sm:$0xff] }
  0x92   : > { %1271 = vmatpush.bf16.msra.mxu0 %v4029_v18  ;;  %v4030_v18 = vld [vmem:[#allocation11 + $0xc0] sm:$0xff] }
  0x96   : > { %1272 = vmatpush.bf16.msra.mxu0 %v4028_v19  ;;  %v4046_v19 = vld [vmem:[#allocation11 + $0x140] sm:$0xff] }
  0x9a   : > { %1273 = vmatpush.bf16.msra.mxu0 %v4027_v22  ;;  %v4059_v22 = vld [vmem:[#allocation12 + $0x68] sm:$0xff] }
  0x9e   : > { %1274 = vmatpush.bf16.msra.mxu0 %v4026_v23  ;;  %v4058_v23 = vld [vmem:[#allocation12 + $0x60] sm:$0xff] }
  0xa2   : > { %1275 = vmatpush.bf16.msra.mxu0 %v4025_v43  ;;  %v4085_v43 = vld [vmem:[#allocation8 + $0x1b8] sm:$0xff] }
  0xa6   : > { %1276 = vmatpush.bf16.msra.mxu0 %v4024_v44  ;;  %v4093_v44 = vld [vmem:[#allocation8 + $0x1f8] sm:$0xff] }
  0xee   : > { %v612_v46 = vpop.f32.mrf.mxu0 }
  0xef   : > { %v613_v47 = vadd.f32 %v4304_v45, %v612_v46  ;;  %v4022_v46 = vld [vmem:[#allocation12] sm:$0xff] }
  0xf1   : > { %v617_v48 = vmax.f32 %v613_v47, 0.0  ;;  %v4045_v47 = vld [vmem:[#allocation11 + $0x138] sm:$0xff] }
  0xf3   : > { %619 = vst [vmem:[#allocation2 + $0x8] sm:$0xff] %v617_v48  ;;  %v4037_v48 = vld [vmem:[#allocation11 + $0xf8] sm:$0xff] }
  0xf6   : > { %v614_v49 = vpop.f32.mrf.mxu0 }
  0xf7   : > { %v615_v50 = vadd.f32 %v4304_v45, %v614_v49  ;;  %v4023_v45 = vld [vmem:[#allocation12 + $0x8] sm:$0xff]  ;;  %v4053_v49 = vld [vmem:[#allocation11 + $0x178] sm:$0xff] }
  0xf8   : > { %1277 = vmatpush.bf16.msra.mxu0 %v4023_v45  ;;  %v4076_v45 = vld [vmem:[#allocation8 + $0x170] sm:$0xff] }
  0xf9   : > { %v618_v51 = vmax.f32 %v615_v50, 0.0  ;;  %v4044_v50 = vld [vmem:[#allocation11 + $0x130] sm:$0xff] }
  0xfb   : > { %620 = vst [vmem:[#allocation2 + $0x10] sm:$0xff] %v618_v51  ;;  %v4036_v51 = vld [vmem:[#allocation11 + $0xf0] sm:$0xff] }
  0xfc   : > { %1278 = vmatpush.bf16.msra.mxu0 %v4022_v46  ;;  %v4068_v46 = vld [vmem:[#allocation8 + $0x130] sm:$0xff] }
 0x102   : > { %v622_v52 = vld [vmem:[#allocation2 + $0x7] ss:$2 sm:$0xff]  ;;  %v641_v53 = vld [vmem:[#allocation2 + $0x8] ss:$2 sm:$0xff] }
 0x103   : > { %v783_v54 = vld [vmem:[#allocation2 + $0x9] ss:$2 sm:$0xff]  ;;  %v865_v55 = vld [vmem:[#allocation2 + $0xa] ss:$2 sm:$0xff]  ;;  %v659_v56 = vpack.c.bf16 %v641_v53, %v641_v53  ;;  %v639_v57 = vpack.c.bf16 %v622_v52, %v622_v52  ;;  %v4043_v53 = vld [vmem:[#allocation11 + $0x128] sm:$0xff] }
 0x104   : > { %v801_v58 = vpack.c.bf16 %v783_v54, %v783_v54  ;;  %952 = vst [vmem:[#allocation2 + $0x10] sm:$0xff] %v4651_v6  ;;  %v883_v59 = vpack.c.bf16 %v865_v55, %v865_v55  ;;  %v4052_v52 = vld [vmem:[#allocation11 + $0x170] sm:$0xff]  ;;  %v4035_v54 = vld [vmem:[#allocation11 + $0xe8] sm:$0xff] }
 0x105   : > { %716 = vmatmul.bf16.vlgmr.msra.gmra.mxu1 %v659_v56  ;;  %777 = vmatmul.bf16.vlgmr.msra.gmra.mxu2 %v639_v57  ;;  %v4051_v56 = vld [vmem:[#allocation11 + $0x168] sm:$0xff]  ;;  %v4042_v57 = vld [vmem:[#allocation11 + $0x120] sm:$0xff] }
 0x106   : > { %858 = vmatmul.bf16.vlgmr.msra.gmra.mxu3 %v801_v58  ;;  %940 = vmatmul.bf16.vlgmr.msrb.gmra.mxu0 %v883_v59  ;;  %v4034_v58 = vld [vmem:[#allocation11 + $0xe0] sm:$0xff] }
 0x107   : > { %1376 = vmatpush.bf16.msra.mxu1 %v4045_v47  ;;  %1437 = vmatpush.bf16.msra.mxu2 %v4037_v48  ;;  %v4050_v59 = vld [vmem:[#allocation11 + $0x160] sm:$0xff]  ;;  %v4084_v47 = vld [vmem:[#allocation8 + $0x1b0] sm:$0xff] }
 0x108   : > { %1518 = vmatpush.bf16.msra.mxu3 %v4053_v49  ;;  %v4092_v48 = vld [vmem:[#allocation8 + $0x1f0] sm:$0xff]  ;;  %v4075_v49 = vld [vmem:[#allocation8 + $0x168] sm:$0xff] }
 0x10b   : > { %1377 = vmatpush.bf16.msra.mxu1 %v4044_v50  ;;  %1438 = vmatpush.bf16.msra.mxu2 %v4036_v51  ;;  %v4067_v50 = vld [vmem:[#allocation8 + $0x128] sm:$0xff] }
 0x10c   : > { %1519 = vmatpush.bf16.msra.mxu3 %v4052_v52  ;;  %v4083_v52 = vld [vmem:[#allocation8 + $0x1a8] sm:$0xff] }
 0x10f   : > { %1378 = vmatpush.bf16.msra.mxu1 %v4043_v53  ;;  %1439 = vmatpush.bf16.msra.mxu2 %v4035_v54  ;;  %v4091_v53 = vld [vmem:[#allocation8 + $0x1e8] sm:$0xff]  ;;  %v4074_v54 = vld [vmem:[#allocation8 + $0x160] sm:$0xff] }
 0x110   : > { %1520 = vmatpush.bf16.msra.mxu3 %v4051_v56  ;;  %v4082_v56 = vld [vmem:[#allocation8 + $0x1a0] sm:$0xff] }
 0x113   : > { %1379 = vmatpush.bf16.msra.mxu1 %v4042_v57  ;;  %1440 = vmatpush.bf16.msra.mxu2 %v4034_v58  ;;  %v4090_v57 = vld [vmem:[#allocation8 + $0x1e0] sm:$0xff] }
 0x114   : > { %1521 = vmatpush.bf16.msra.mxu3 %v4050_v59 }
 0x117   : > { %1380 = vmatpush.bf16.msra.mxu1 %v4041_v8  ;;  %1441 = vmatpush.bf16.msra.mxu2 %v4033_v10  ;;  %v4081_v8 = vld [vmem:[#allocation8 + $0x198] sm:$0xff]  ;;  %v4072_v10 = vld [vmem:[#allocation8 + $0x150] sm:$0xff] }
 0x118   : > { %1522 = vmatpush.bf16.msra.mxu3 %v4049_v11  ;;  %v4064_v11 = vld [vmem:[#allocation8 + $0x110] sm:$0xff] }
 0x11b   : > { %1381 = vmatpush.bf16.msra.mxu1 %v4040_v9  ;;  %1442 = vmatpush.bf16.msra.mxu2 %v4032_v13  ;;  %v4089_v9 = vld [vmem:[#allocation8 + $0x1d8] sm:$0xff]  ;;  %v4088_v13 = vld [vmem:[#allocation8 + $0x1d0] sm:$0xff] }
 0x11c   : > { %1523 = vmatpush.bf16.msra.mxu3 %v4048_v14  ;;  %v4071_v14 = vld [vmem:[#allocation8 + $0x148] sm:$0xff] }
 0x11f   : > { %1382 = vmatpush.bf16.msra.mxu1 %v4039_v12  ;;  %1443 = vmatpush.bf16.msra.mxu2 %v4031_v16  ;;  %v4080_v12 = vld [vmem:[#allocation8 + $0x190] sm:$0xff]  ;;  %v4079_v16 = vld [vmem:[#allocation8 + $0x188] sm:$0xff] }
 0x120   : > { %1524 = vmatpush.bf16.msra.mxu3 %v4047_v17  ;;  %v4087_v17 = vld [vmem:[#allocation8 + $0x1c8] sm:$0xff] }
 0x123   : > { %1383 = vmatpush.bf16.msra.mxu1 %v4038_v15  ;;  %1444 = vmatpush.bf16.msra.mxu2 %v4030_v18  ;;  %v4063_v15 = vld [vmem:[#allocation8 + $0x108] sm:$0xff]  ;;  %v4070_v18 = vld [vmem:[#allocation8 + $0x140] sm:$0xff] }
 0x124   : > { %1525 = vmatpush.bf16.msra.mxu3 %v4046_v19  ;;  %v4062_v19 = vld [vmem:[#allocation8 + $0x100] sm:$0xff] }
 0x182   : > { %v717_v20 = vpop.f32.mrf.mxu1 }
 0x183   : > { %v941_v21 = vpop.f32.mrf.mxu0 }
 0x188   : > { %v778_v24 = vpop.f32.mrf.mxu2 }
 0x189   : > { %v779_v25 = vadd.f32 %v778_v24, %v717_v20  ;;  %v859_v26 = vpop.f32.mrf.mxu3  ;;  %v4061_v20 = vld [vmem:[#allocation12 + $0x78] sm:$0xff]  ;;  %v4307_v24 = vld [vmem:[#allocation14] ss:$0 sm:$0xff] }
 0x18a   : > { %v719_v27 = vpop.f32.mrf.mxu1  ;;  %1608 = vmatpush.bf16.msrb.mxu0 %v4061_v20  ;;  %v4078_v20 = vld [vmem:[#allocation8 + $0x180] sm:$0xff] }
 0x18b   : > { %v863_v28 = vadd.f32 %v859_v26, %v779_v25  ;;  %v943_v30 = vpop.f32.mrf.mxu0 }
 0x18d   : > { %v945_v31 = vadd.f32 %v941_v21, %v863_v28  ;;  %v4060_v21 = vld [vmem:[#allocation12 + $0x70] sm:$0xff] }
 0x18e   : > { %1609 = vmatpush.bf16.msrb.mxu0 %v4060_v21  ;;  %v4086_v21 = vld [vmem:[#allocation8 + $0x1c0] sm:$0xff] }
 0x18f   : > { %v4896_v32 = vadd.f32 %v4305_v29, %v945_v31 }
 0x190   : > { %v780_v33 = vpop.f32.mrf.mxu2 }
 0x191   : > { %951 = vst [vmem:[#allocation2 + $0x8] sm:$0xff] %v4896_v32  ;;  %v861_v34 = vpop.f32.mrf.mxu3  ;;  %v974_v35 = vmax.f32 %v4896_v32, 0.0 }
 0x192   : > { %1610 = vmatpush.bf16.msrb.mxu0 %v4059_v22  ;;  %v4109_v22 = vld [vmem:[#allocation11 + $0x1f8] sm:$0xff] }
 0x193   : > { %v992_v36 = vpack.c.bf16 %v974_v35, %v974_v35 }
 0x195   : > { %1049 = vmatmul.bf16.vlgmr.msrb.gmra.mxu1 %v992_v36 }
 0x196   : > { %1611 = vmatpush.bf16.msrb.mxu0 %v4058_v23  ;;  %v4101_v23 = vld [vmem:[#allocation11 + $0x1b8] sm:$0xff] }
 0x198   : > { %v955_v37 = vld [vmem:[#allocation2 + $0x5] sm:$0xff] }
 0x199   : > { %v1115_v38 = vld [vmem:[#allocation2 + $0xb] sm:$0xff]  ;;  %v956_v39 = vmax.f32 %v955_v37, 0.0 }
 0x19a   : > { %v1116_v40 = vmax.f32 %v1115_v38, 0.0  ;;  %v4057_v38 = vld [vmem:[#allocation12 + $0x58] sm:$0xff] }
 0x19b   : > { %v973_v41 = vpack.c.bf16 %v956_v39, %v956_v39  ;;  %1612 = vmatpush.bf16.msrb.mxu0 %v4057_v38  ;;  %v4056_v39 = vld [vmem:[#allocation12 + $0x50] sm:$0xff] }
 0x19c   : > { %v1134_v42 = vpack.c.bf16 %v1116_v40, %v1116_v40  ;;  %v4054_v40 = vld [vmem:[#allocation12 + $0x40] sm:$0xff] }
 0x19d   : > { %1110 = vmatmul.bf16.vlgmr.msrb.gmra.mxu2 %v973_v41  ;;  %v4077_v41 = vld [vmem:[#allocation8 + $0x178] sm:$0xff] }
 0x19e   : > { %1191 = vmatmul.bf16.vlgmr.msrb.gmra.mxu3 %v1134_v42  ;;  %v4069_v42 = vld [vmem:[#allocation8 + $0x138] sm:$0xff]  ;;  %1709 = vmatpush.bf16.msrb.mxu1 %v4077_v41 }
 0x19f   : > { %1613 = vmatpush.bf16.msrb.mxu0 %v4056_v39  ;;  %1770 = vmatpush.bf16.msrb.mxu2 %v4069_v42  ;;  %v4116_v41 = vld [vmem:[#allocation11 + $0x230] sm:$0xff]  ;;  %v4099_v42 = vld [vmem:[#allocation11 + $0x1a8] sm:$0xff] }
 0x1a0   : > { %1850 = vmatpush.bf16.msrb.mxu3 %v4085_v43  ;;  %v4115_v43 = vld [vmem:[#allocation11 + $0x228] sm:$0xff] }
 0x1a2   : > { %1710 = vmatpush.bf16.msrb.mxu1 %v4076_v45  ;;  %v4098_v45 = vld [vmem:[#allocation11 + $0x1a0] sm:$0xff] }
 0x1a3   : > { %1771 = vmatpush.bf16.msrb.mxu2 %v4068_v46  ;;  %v4114_v46 = vld [vmem:[#allocation11 + $0x220] sm:$0xff] }
 0x1a4   : > { %1851 = vmatpush.bf16.msrb.mxu3 %v4084_v47  ;;  %v4097_v47 = vld [vmem:[#allocation11 + $0x198] sm:$0xff] }
 0x1a6   : > { %1711 = vmatpush.bf16.msrb.mxu1 %v4075_v49  ;;  %v4104_v49 = vld [vmem:[#allocation11 + $0x1d0] sm:$0xff] }
 0x1a7   : > { %1772 = vmatpush.bf16.msrb.mxu2 %v4067_v50  ;;  %v4096_v50 = vld [vmem:[#allocation11 + $0x190] sm:$0xff] }
 0x1a8   : > { %1852 = vmatpush.bf16.msrb.mxu3 %v4083_v52  ;;  %v4103_v52 = vld [vmem:[#allocation11 + $0x1c8] sm:$0xff] }
 0x1aa   : > { %1712 = vmatpush.bf16.msrb.mxu1 %v4074_v54  ;;  %v4111_v54 = vld [vmem:[#allocation11 + $0x208] sm:$0xff] }
 0x1ac   : > { %1853 = vmatpush.bf16.msrb.mxu3 %v4082_v56  ;;  %v4094_v56 = vld [vmem:[#allocation11 + $0x180] sm:$0xff] }
 0x1b0   : > { %1854 = vmatpush.bf16.msrb.mxu3 %v4081_v8 }
 0x1b4   : > { %1855 = vmatpush.bf16.msrb.mxu3 %v4080_v12 }
 0x1b8   : > { %1856 = vmatpush.bf16.msrb.mxu3 %v4079_v16 }
 0x1bc   : > { %1857 = vmatpush.bf16.msrb.mxu3 %v4078_v20 }
 0x212   : > { %v1050_v55 = vpop.f32.mrf.mxu1 }
 0x21a   : > { %v1052_v60 = vpop.f32.mrf.mxu1 }
 0x220   : > { %v1111_v61 = vpop.f32.mrf.mxu2 }
 0x221   : > { %v1192_v62 = vpop.f32.mrf.mxu3  ;;  %v1112_v63 = vadd.f32 %v1111_v61, %v1050_v55  ;;  %v4066_v55 = vld [vmem:[#allocation8 + $0x120] sm:$0xff] }
 0x222   : > { %1773 = vmatpush.bf16.msrb.mxu2 %v4066_v55  ;;  %v4102_v55 = vld [vmem:[#allocation11 + $0x1c0] sm:$0xff] }
 0x223   : > { %v1196_v1 = vadd.f32 %v1192_v62, %v1112_v63  ;;  %v4308_v62 = vld [vmem:[%s4970_s6 + $0x1] ss:$0 sm:$0xff] }
 0x225   : > { %v1200_v2 = vadd.f32 %v4306_v0, %v1196_v1 }
 0x227   : > { %v1201_v3 = vmax.f32 %v1200_v2, 0.0 }
 0x228   : > { %v1113_v4 = vpop.f32.mrf.mxu2 }
 0x229   : > { %v1194_v5 = vpop.f32.mrf.mxu3  ;;  %v1218_v7 = vpack.c.bf16 %v1201_v3, %v1201_v3 }
 0x22a   : > { %v4073_v5 = vld [vmem:[#allocation8 + $0x158] sm:$0xff] }
 0x22b   : > { %1279 = vmatmul.bf16.vlgmr.msra.gmra.mxu0 %v1218_v7  ;;  %v4065_v7 = vld [vmem:[#allocation8 + $0x118] sm:$0xff]  ;;  %1713 = vmatpush.bf16.msrb.mxu1 %v4073_v5  ;;  %v4310_v5 = vld [vmem:[#allocation9 + $0x1] ss:$0 sm:$0xff] }
 0x22c   : > { %1774 = vmatpush.bf16.msrb.mxu2 %v4065_v7 }
 0x22f   : > { %1714 = vmatpush.bf16.msrb.mxu1 %v4072_v10 }
 0x230   : > { %1775 = vmatpush.bf16.msrb.mxu2 %v4064_v11 }
 0x233   : > { %1715 = vmatpush.bf16.msrb.mxu1 %v4071_v14 }
 0x234   : > { %1776 = vmatpush.bf16.msrb.mxu2 %v4063_v15 }
 0x237   : > { %1716 = vmatpush.bf16.msrb.mxu1 %v4070_v18 }
 0x238   : > { %1777 = vmatpush.bf16.msrb.mxu2 %v4062_v19 }
 0x2a8   : > { %v1280_v25 = vpop.f32.mrf.mxu0 }
 0x2a9   : > { %v1281_v26 = vadd.f32 %v4307_v24, %v1280_v25  ;;  %v4117_v24 = vld [vmem:[#allocation11 + $0x238] sm:$0xff]  ;;  %v4309_v25 = vld [vmem:[#allocation14 + $0x1] ss:$0 sm:$0xff] }
 0x2ab   : > { %v4904_v27 = vadd.f32 %v1281_v26, %v4896_v32  ;;  %v4055_v32 = vld [vmem:[#allocation12 + $0x48] sm:$0xff] }
 0x2ac   : > { %1614 = vmatpush.bf16.msrb.mxu0 %v4055_v32  ;;  %v4108_v32 = vld [vmem:[#allocation11 + $0x1f0] sm:$0xff] }
 0x2ad   : > { %1285 = vst [vmem:[#allocation2 + $0x8] sm:$0xff] %v4904_v27  ;;  %v1309_v28 = vmax.f32 %v4904_v27, 0.0 }
 0x2af   : > { %v1327_v29 = vpack.c.bf16 %v1309_v28, %v1309_v28 }
 0x2b0   : > { %v1282_v30 = vpop.f32.mrf.mxu0  ;;  %1615 = vmatpush.bf16.msrb.mxu0 %v4054_v40  ;;  %v4100_v40 = vld [vmem:[#allocation11 + $0x1b0] sm:$0xff] }
 0x2b1   : > { %1384 = vmatmul.bf16.vlgmr.msra.gmra.mxu1 %v1327_v29 }
 0x2b2   : > { %2043 = vmatpush.bf16.msra.mxu1 %v4109_v22  ;;  %v4120_v22 = vld [vmem:[#allocation12 + $0x90] sm:$0xff] }
 0x2b4   : > { %v1289_v31 = vld [vmem:[#allocation2 + $0x7] sm:$0xff]  ;;  %1931 = vmatpush.bf16.msra.mxu0 %v4093_v44  ;;  %v4106_v44 = vld [vmem:[#allocation11 + $0x1e0] sm:$0xff] }
 0x2b5   : > { %v1450_v33 = vld [vmem:[#allocation2 + $0x9] sm:$0xff]  ;;  %v1290_v34 = vmax.f32 %v1289_v31, 0.0 }
 0x2b6   : > { %v1451_v35 = vmax.f32 %v1450_v33, 0.0  ;;  %2044 = vmatpush.bf16.msra.mxu1 %v4108_v32 }
 0x2b7   : > { %v1308_v36 = vpack.c.bf16 %v1290_v34, %v1290_v34 }
 0x2b8   : > { %v1469_v37 = vpack.c.bf16 %v1451_v35, %v1451_v35  ;;  %1932 = vmatpush.bf16.msra.mxu0 %v4092_v48  ;;  %v4113_v48 = vld [vmem:[#allocation11 + $0x218] sm:$0xff] }
 0x2b9   : > { %1445 = vmatmul.bf16.vlgmr.msra.gmra.mxu2 %v1308_v36 }
 0x2ba   : > { %1526 = vmatmul.bf16.vlgmr.msra.gmra.mxu3 %v1469_v37  ;;  %2104 = vmatpush.bf16.msra.mxu2 %v4101_v23  ;;  %v4119_v23 = vld [vmem:[#allocation12 + $0x88] sm:$0xff] }
 0x2bb   : > { %2185 = vmatpush.bf16.msra.mxu3 %v4117_v24  ;;  %v4118_v24 = vld [vmem:[#allocation12 + $0x80] sm:$0xff] }
 0x2bc   : > { %1933 = vmatpush.bf16.msra.mxu0 %v4091_v53  ;;  %v4095_v53 = vld [vmem:[#allocation11 + $0x188] sm:$0xff] }
 0x2be   : > { %2105 = vmatpush.bf16.msra.mxu2 %v4100_v40 }
 0x2bf   : > { %2186 = vmatpush.bf16.msra.mxu3 %v4116_v41 }
 0x2c0   : > { %1934 = vmatpush.bf16.msra.mxu0 %v4090_v57  ;;  %v4110_v57 = vld [vmem:[#allocation11 + $0x200] sm:$0xff] }
 0x2c2   : > { %2106 = vmatpush.bf16.msra.mxu2 %v4099_v42 }
 0x2c3   : > { %2187 = vmatpush.bf16.msra.mxu3 %v4115_v43 }
 0x2c4   : > { %1935 = vmatpush.bf16.msra.mxu0 %v4089_v9 }
 0x2c6   : > { %2107 = vmatpush.bf16.msra.mxu2 %v4098_v45 }
 0x2c7   : > { %2188 = vmatpush.bf16.msra.mxu3 %v4114_v46 }
 0x2c8   : > { %1936 = vmatpush.bf16.msra.mxu0 %v4088_v13 }
 0x2ca   : > { %2108 = vmatpush.bf16.msra.mxu2 %v4097_v47 }
 0x2cb   : > { %2189 = vmatpush.bf16.msra.mxu3 %v4113_v48  ;;  %v4137_v48 = vld [vmem:[#allocation11 + $0x298] sm:$0xff] }
 0x2cc   : > { %1937 = vmatpush.bf16.msra.mxu0 %v4087_v17 }
 0x2ce   : > { %2109 = vmatpush.bf16.msra.mxu2 %v4096_v50  ;;  %v4145_v50 = vld [vmem:[#allocation11 + $0x2d8] sm:$0xff] }
 0x2d0   : > { %1938 = vmatpush.bf16.msra.mxu0 %v4086_v21  ;;  %v4121_v21 = vld [vmem:[#allocation12 + $0x98] sm:$0xff] }
 0x2d2   : > { %2110 = vmatpush.bf16.msra.mxu2 %v4095_v53  ;;  %v4144_v53 = vld [vmem:[#allocation11 + $0x2d0] sm:$0xff] }
 0x2d6   : > { %2111 = vmatpush.bf16.msra.mxu2 %v4094_v56  ;;  %v4143_v56 = vld [vmem:[#allocation11 + $0x2c8] sm:$0xff] }
 0x32e   : > { %v1385_v51 = vpop.f32.mrf.mxu1 }
 0x336   : > { %v1387_v58 = vpop.f32.mrf.mxu1 }
 0x337   : > { %v4125_v58 = vld [vmem:[#allocation12 + $0xb8] sm:$0xff] }
 0x33c   : > { %v1446_v59 = vpop.f32.mrf.mxu2 }
 0x33d   : > { %v1527_v60 = vpop.f32.mrf.mxu3  ;;  %v1447_v61 = vadd.f32 %v1446_v59, %v1385_v51  ;;  %v4112_v51 = vld [vmem:[#allocation11 + $0x210] sm:$0xff] }
 0x33e   : > { %2190 = vmatpush.bf16.msra.mxu3 %v4112_v51  ;;  %v4124_v59 = vld [vmem:[#allocation12 + $0xb0] sm:$0xff] }
 0x33f   : > { %v1531_v63 = vadd.f32 %v1527_v60, %v1447_v61  ;;  %v4136_v51 = vld [vmem:[#allocation11 + $0x290] sm:$0xff] }
 0x341   : > { %v1535_v0 = vadd.f32 %v4308_v62, %v1531_v63  ;;  %v4123_v62 = vld [vmem:[#allocation12 + $0xa8] sm:$0xff] }
 0x342   : > { %2191 = vmatpush.bf16.msra.mxu3 %v4111_v54  ;;  %v4135_v54 = vld [vmem:[#allocation11 + $0x288] sm:$0xff] }
 0x343   : > { %v1536_v1 = vmax.f32 %v1535_v0, 0.0  ;;  %v4122_v0 = vld [vmem:[#allocation12 + $0xa0] sm:$0xff] }
 0x344   : > { %v1448_v2 = vpop.f32.mrf.mxu2 }
 0x345   : > { %v1529_v3 = vpop.f32.mrf.mxu3  ;;  %v1554_v4 = vpack.c.bf16 %v1536_v1, %v1536_v1 }
 0x346   : > { %2192 = vmatpush.bf16.msra.mxu3 %v4110_v57  ;;  %v4134_v57 = vld [vmem:[#allocation11 + $0x280] sm:$0xff] }
 0x347   : > { %1616 = vmatmul.bf16.vlgmr.msrb.gmra.mxu0 %v1554_v4 }
 0x348   : > { %2275 = vmatpush.bf16.msrb.mxu0 %v4125_v58  ;;  %v4126_v58 = vld [vmem:[#allocation11 + $0x240] sm:$0xff] }
 0x34c   : > { %2276 = vmatpush.bf16.msrb.mxu0 %v4124_v59  ;;  %v4142_v59 = vld [vmem:[#allocation11 + $0x2c0] sm:$0xff] }
 0x350   : > { %2277 = vmatpush.bf16.msrb.mxu0 %v4123_v62  ;;  %v4155_v62 = vld [vmem:[#allocation12 + $0xe8] sm:$0xff] }
 0x354   : > { %2278 = vmatpush.bf16.msrb.mxu0 %v4122_v0  ;;  %v4312_v0 = vld [vmem:[#allocation14 + $0x2] ss:$0 sm:$0xff] }
 0x358   : > { %2279 = vmatpush.bf16.msrb.mxu0 %v4121_v21  ;;  %v4181_v21 = vld [vmem:[#allocation15 + $0xb8] sm:$0xff] }
 0x35c   : > { %2280 = vmatpush.bf16.msrb.mxu0 %v4120_v22  ;;  %v4172_v22 = vld [vmem:[#allocation15 + $0x70] sm:$0xff] }
 0x360   : > { %2281 = vmatpush.bf16.msrb.mxu0 %v4119_v23  ;;  %v4164_v23 = vld [vmem:[#allocation15 + $0x30] sm:$0xff] }
 0x364   : > { %2282 = vmatpush.bf16.msrb.mxu0 %v4118_v24  ;;  %v4180_v24 = vld [vmem:[#allocation15 + $0xb0] sm:$0xff] }
 0x3c4   : > { %v1617_v26 = vpop.f32.mrf.mxu0 }
 0x3c5   : > { %v1618_v28 = vadd.f32 %v4309_v25, %v1617_v26  ;;  %v4141_v25 = vld [vmem:[#allocation11 + $0x2b8] sm:$0xff] }
 0x3c6   : > { %v4133_v26 = vld [vmem:[#allocation11 + $0x278] sm:$0xff] }
 0x3c7   : > { %v1621_v29 = vadd.f32 %v1618_v28, %v4904_v27  ;;  %v4107_v27 = vld [vmem:[#allocation11 + $0x1e8] sm:$0xff]  ;;  %v4149_v28 = vld [vmem:[#allocation11 + $0x2f8] sm:$0xff] }
 0x3c8   : > { %2045 = vmatpush.bf16.msra.mxu1 %v4107_v27  ;;  %v4311_v27 = vld [vmem:[%s4970_s6 + $0x2] ss:$0 sm:$0xff] }
 0x3c9   : > { %1622 = vst [vmem:[#allocation2 + $0x8] sm:$0xff] %v1621_v29  ;;  %v4140_v29 = vld [vmem:[#allocation11 + $0x2b0] sm:$0xff] }
 0x3cc   : > { %v1619_v30 = vpop.f32.mrf.mxu0  ;;  %2046 = vmatpush.bf16.msra.mxu1 %v4106_v44 }
 0x3cd   : > { %v4132_v30 = vld [vmem:[#allocation11 + $0x270] sm:$0xff] }
 0x3d0   : > { %v1642_v31 = vld [vmem:[#allocation2 + $0x8] ss:$2 sm:$0xf]  ;;  %v1623_v33 = vld [vmem:[#allocation2 + $0x7] ss:$2 sm:$0xf] }
 0x3d1   : > { %v1660_v34 = vpack.c.bf16 %v1642_v31, %v1642_v31  ;;  %v1641_v35 = vpack.c.bf16 %v1623_v33, %v1623_v33  ;;  %v1783_v36 = vld [vmem:[#allocation2 + $0x9] ss:$2 sm:$0xf]  ;;  %v1864_v37 = vld [vmem:[#allocation2 + $0xa] ss:$2 sm:$0xf] }
 0x3d2   : > { %v1801_v38 = vpack.c.bf16 %v1783_v36, %v1783_v36  ;;  %v1882_v39 = vpack.c.bf16 %v1864_v37, %v1864_v37  ;;  %1952 = vst [vmem:[#allocation2 + $0xc] sm:$0xff] %v4651_v6  ;;  %v4105_v6 = vld [vmem:[#allocation11 + $0x1d8] sm:$0xff]  ;;  %v4148_v31 = vld [vmem:[#allocation11 + $0x2f0] sm:$0xff]  ;;  %v4139_v33 = vld [vmem:[#allocation11 + $0x2a8] sm:$0xff] }
 0x3d3   : > { %1717 = vmatmul.bf16.vlgmr.msrb.gmra.mxu1 %v1660_v34  ;;  %1778 = vmatmul.bf16.vlgmr.msrb.gmra.mxu2 %v1641_v35  ;;  %v4131_v34 = vld [vmem:[#allocation11 + $0x268] sm:$0xff]  ;;  %v4138_v36 = vld [vmem:[#allocation11 + $0x2a0] sm:$0xff] }
 0x3d4   : > { %1858 = vmatmul.bf16.vlgmr.msrb.gmra.mxu3 %v1801_v38  ;;  %1939 = vmatmul.bf16.vlgmr.msra.gmra.mxu0 %v1882_v39  ;;  %v4147_v35 = vld [vmem:[#allocation11 + $0x2e8] sm:$0xff]  ;;  %v4130_v37 = vld [vmem:[#allocation11 + $0x260] sm:$0xff] }
 0x3d5   : > { %2047 = vmatpush.bf16.msra.mxu1 %v4105_v6  ;;  %2441 = vmatpush.bf16.msrb.mxu2 %v4133_v26  ;;  %v4146_v38 = vld [vmem:[#allocation11 + $0x2e0] sm:$0xff]  ;;  %v4163_v26 = vld [vmem:[#allocation15 + $0x28] sm:$0xff] }
 0x3d6   : > { %2522 = vmatpush.bf16.msrb.mxu3 %v4149_v28  ;;  %v4179_v28 = vld [vmem:[#allocation15 + $0xa8] sm:$0xff] }
 0x3d9   : > { %2048 = vmatpush.bf16.msra.mxu1 %v4104_v49  ;;  %2442 = vmatpush.bf16.msrb.mxu2 %v4132_v30  ;;  %v4129_v49 = vld [vmem:[#allocation11 + $0x258] sm:$0xff]  ;;  %v4162_v30 = vld [vmem:[#allocation15 + $0x20] sm:$0xff] }
 0x3da   : > { %2523 = vmatpush.bf16.msrb.mxu3 %v4148_v31  ;;  %v4178_v31 = vld [vmem:[#allocation15 + $0xa0] sm:$0xff] }
 0x3dd   : > { %2049 = vmatpush.bf16.msra.mxu1 %v4103_v52  ;;  %2443 = vmatpush.bf16.msrb.mxu2 %v4131_v34  ;;  %v4128_v52 = vld [vmem:[#allocation11 + $0x250] sm:$0xff] }
 0x3de   : > { %2524 = vmatpush.bf16.msrb.mxu3 %v4147_v35 }
 0x3e1   : > { %2050 = vmatpush.bf16.msra.mxu1 %v4102_v55  ;;  %2444 = vmatpush.bf16.msrb.mxu2 %v4130_v37  ;;  %v4127_v55 = vld [vmem:[#allocation11 + $0x248] sm:$0xff]  ;;  %v4313_v37 = vld [vmem:[%s4970_s6 + $0x3] ss:$0 sm:$0xff] }
 0x3e2   : > { %2525 = vmatpush.bf16.msrb.mxu3 %v4146_v38 }
 0x3e5   : > { %2380 = vmatpush.bf16.msrb.mxu1 %v4141_v25  ;;  %2445 = vmatpush.bf16.msrb.mxu2 %v4129_v49  ;;  %v4171_v25 = vld [vmem:[#allocation15 + $0x68] sm:$0xff] }
 0x3e6   : > { %2526 = vmatpush.bf16.msrb.mxu3 %v4145_v50  ;;  %v4159_v49 = vld [vmem:[#allocation15 + $0x8] sm:$0xff] }
 0x3e7   : > { %v4175_v50 = vld [vmem:[#allocation15 + $0x88] sm:$0xff] }
 0x3e9   : > { %2381 = vmatpush.bf16.msrb.mxu1 %v4140_v29  ;;  %2446 = vmatpush.bf16.msrb.mxu2 %v4128_v52  ;;  %v4170_v29 = vld [vmem:[#allocation15 + $0x60] sm:$0xff] }
 0x3ea   : > { %2527 = vmatpush.bf16.msrb.mxu3 %v4144_v53  ;;  %v4158_v52 = vld [vmem:[#allocation15] sm:$0xff] }
 0x3eb   : > { %v4174_v53 = vld [vmem:[#allocation15 + $0x80] sm:$0xff] }
 0x3ed   : > { %2382 = vmatpush.bf16.msrb.mxu1 %v4139_v33  ;;  %2447 = vmatpush.bf16.msrb.mxu2 %v4127_v55 }
 0x3ee   : > { %2528 = vmatpush.bf16.msrb.mxu3 %v4143_v56 }
 0x3f1   : > { %2383 = vmatpush.bf16.msrb.mxu1 %v4138_v36  ;;  %2448 = vmatpush.bf16.msrb.mxu2 %v4126_v58 }
 0x3f2   : > { %2529 = vmatpush.bf16.msrb.mxu3 %v4142_v59 }
 0x3f5   : > { %2384 = vmatpush.bf16.msrb.mxu1 %v4137_v48  ;;  %v4167_v48 = vld [vmem:[#allocation15 + $0x48] sm:$0xff] }
 0x3f9   : > { %2385 = vmatpush.bf16.msrb.mxu1 %v4136_v51  ;;  %v4166_v51 = vld [vmem:[#allocation15 + $0x40] sm:$0xff] }
 0x3fd   : > { %2386 = vmatpush.bf16.msrb.mxu1 %v4135_v54  ;;  %v4314_v54 = vld [vmem:[#allocation14 + $0x3] ss:$0 sm:$0xff] }
 0x401   : > { %2387 = vmatpush.bf16.msrb.mxu1 %v4134_v57 }
 0x450   : > { %v1718_v60 = vpop.f32.mrf.mxu1 }
 0x451   : > { %v1940_v61 = vpop.f32.mrf.mxu0 }
 0x456   : > { %v1779_v63 = vpop.f32.mrf.mxu2 }
 0x457   : > { %v1780_v1 = vadd.f32 %v1779_v63, %v1718_v60  ;;  %v1859_v2 = vpop.f32.mrf.mxu3  ;;  %v4157_v60 = vld [vmem:[#allocation12 + $0xf8] sm:$0xff]  ;;  %v4154_v63 = vld [vmem:[#allocation12 + $0xe0] sm:$0xff] }
 0x458   : > { %v1720_v3 = vpop.f32.mrf.mxu1  ;;  %2612 = vmatpush.bf16.msra.mxu0 %v4157_v60 }
 0x459   : > { %v1863_v4 = vadd.f32 %v1859_v2, %v1780_v1  ;;  %v1942_v7 = vpop.f32.mrf.mxu0 }
 0x45b   : > { %v1944_v8 = vadd.f32 %v1940_v61, %v1863_v4  ;;  %v4156_v61 = vld [vmem:[#allocation12 + $0xf0] sm:$0xff] }
 0x45c   : > { %2613 = vmatpush.bf16.msra.mxu0 %v4156_v61 }
 0x45d   : > { %v1950_v9 = vadd.f32 %v4310_v5, %v1944_v8 }
 0x45e   : > { %v1781_v10 = vpop.f32.mrf.mxu2 }
 0x45f   : > { %1951 = vst [vmem:[#allocation2 + $0x8] sm:$0xf] %v1950_v9  ;;  %v1861_v11 = vpop.f32.mrf.mxu3 }
 0x460   : > { %2614 = vmatpush.bf16.msra.mxu0 %v4155_v62 }
 0x464   : > { %2615 = vmatpush.bf16.msra.mxu0 %v4154_v63 }
 0x466   : > { %v4913_v12 = vld [vmem:[#allocation2 + $0x8] sm:$0xf] }
 0x467   : > { %v1956_v13 = vld [vmem:[#allocation2 + $0x5] sm:$0xf]  ;;  %v2117_v14 = vld [vmem:[#allocation2 + $0xb] sm:$0xf]  ;;  %v1976_v15 = vmax.f32 %v4913_v12, 0.0 }
 0x468   : > { %v1957_v16 = vmax.f32 %v1956_v13, 0.0  ;;  %v2118_v17 = vmax.f32 %v2117_v14, 0.0 }
 0x469   : > { %v1994_v18 = vpack.c.bf16 %v1976_v15, %v1976_v15 }
 0x46a   : > { %v1975_v19 = vpack.c.bf16 %v1957_v16, %v1957_v16  ;;  %v2136_v20 = vpack.c.bf16 %v2118_v17, %v2118_v17  ;;  %v4153_v16 = vld [vmem:[#allocation12 + $0xd8] sm:$0xff]  ;;  %v4152_v17 = vld [vmem:[#allocation12 + $0xd0] sm:$0xff] }
 0x46b   : > { %2051 = vmatmul.bf16.vlgmr.msra.gmra.mxu1 %v1994_v18  ;;  %2616 = vmatpush.bf16.msra.mxu0 %v4153_v16  ;;  %v4150_v18 = vld [vmem:[#allocation12 + $0xc0] sm:$0xff] }
 0x46c   : > { %2112 = vmatmul.bf16.vlgmr.msra.gmra.mxu2 %v1975_v19  ;;  %2193 = vmatmul.bf16.vlgmr.msra.gmra.mxu3 %v2136_v20  ;;  %v4173_v19 = vld [vmem:[#allocation15 + $0x78] sm:$0xff] }
 0x46d   : > { %v4165_v20 = vld [vmem:[#allocation15 + $0x38] sm:$0xff]  ;;  %2713 = vmatpush.bf16.msra.mxu1 %v4173_v19  ;;  %2854 = vmatpush.bf16.msra.mxu3 %v4181_v21 }
 0x46e   : > { %2774 = vmatpush.bf16.msra.mxu2 %v4165_v20 }
 0x46f   : > { %2617 = vmatpush.bf16.msra.mxu0 %v4152_v17 }
 0x471   : > { %2714 = vmatpush.bf16.msra.mxu1 %v4172_v22  ;;  %2855 = vmatpush.bf16.msra.mxu3 %v4180_v24 }
 0x472   : > { %2775 = vmatpush.bf16.msra.mxu2 %v4164_v23 }
 0x475   : > { %2715 = vmatpush.bf16.msra.mxu1 %v4171_v25  ;;  %2856 = vmatpush.bf16.msra.mxu3 %v4179_v28 }
 0x476   : > { %2776 = vmatpush.bf16.msra.mxu2 %v4163_v26 }
 0x479   : > { %2716 = vmatpush.bf16.msra.mxu1 %v4170_v29  ;;  %2857 = vmatpush.bf16.msra.mxu3 %v4178_v31 }
 0x47a   : > { %2777 = vmatpush.bf16.msra.mxu2 %v4162_v30 }
 0x4e8   : > { %v2052_v39 = vpop.f32.mrf.mxu1 }
 0x4ef   : > { %v2113_v32 = vpop.f32.mrf.mxu2  ;;  %v2194_v41 = vpop.f32.mrf.mxu3 }
 0x4f0   : > { %v2114_v40 = vadd.f32 %v2113_v32, %v2052_v39  ;;  %v2054_v42 = vpop.f32.mrf.mxu1 }
 0x4f2   : > { %v2198_v43 = vadd.f32 %v2194_v41, %v2114_v40 }
 0x4f4   : > { %v2202_v44 = vadd.f32 %v4311_v27, %v2198_v43  ;;  %v4169_v43 = vld [vmem:[#allocation15 + $0x58] sm:$0xff] }
 0x4f5   : > { %2717 = vmatpush.bf16.msra.mxu1 %v4169_v43 }
 0x4f6   : > { %v2203_v45 = vmax.f32 %v2202_v44, 0.0  ;;  %v4161_v44 = vld [vmem:[#allocation15 + $0x18] sm:$0xff] }
 0x4f7   : > { %v2115_v46 = vpop.f32.mrf.mxu2  ;;  %v2196_v47 = vpop.f32.mrf.mxu3  ;;  %2778 = vmatpush.bf16.msra.mxu2 %v4161_v44 }
 0x4f8   : > { %v2221_v6 = vpack.c.bf16 %v2203_v45, %v2203_v45  ;;  %v4177_v45 = vld [vmem:[#allocation15 + $0x98] sm:$0xff]  ;;  %v4168_v46 = vld [vmem:[#allocation15 + $0x50] sm:$0xff] }
 0x4f9   : > { %2858 = vmatpush.bf16.msra.mxu3 %v4177_v45  ;;  %v4176_v47 = vld [vmem:[#allocation15 + $0x90] sm:$0xff]  ;;  %2718 = vmatpush.bf16.msra.mxu1 %v4168_v46 }
 0x4fa   : > { %2283 = vmatmul.bf16.vlgmr.msrb.gmra.mxu0 %v2221_v6  ;;  %v4160_v6 = vld [vmem:[#allocation15 + $0x10] sm:$0xff] }
 0x4fb   : > { %2779 = vmatpush.bf16.msra.mxu2 %v4160_v6 }
 0x4fd   : > { %2859 = vmatpush.bf16.msra.mxu3 %v4176_v47  ;;  %2719 = vmatpush.bf16.msra.mxu1 %v4167_v48 }
 0x4ff   : > { %2780 = vmatpush.bf16.msra.mxu2 %v4159_v49 }
 0x501   : > { %2860 = vmatpush.bf16.msra.mxu3 %v4175_v50  ;;  %2720 = vmatpush.bf16.msra.mxu1 %v4166_v51 }
 0x503   : > { %2781 = vmatpush.bf16.msra.mxu2 %v4158_v52 }
 0x505   : > { %2861 = vmatpush.bf16.msra.mxu3 %v4174_v53 }
 0x577   : > { %v2284_v1 = vpop.f32.mrf.mxu0 }
 0x578   : > { %v2285_v2 = vadd.f32 %v4312_v0, %v2284_v1 }
 0x57a   : > { %v2288_v3 = vadd.f32 %v2285_v2, %v4913_v12  ;;  %v4151_v12 = vld [vmem:[#allocation12 + $0xc8] sm:$0xff] }
 0x57b   : > { %2618 = vmatpush.bf16.msra.mxu0 %v4151_v12 }
 0x57c   : > { %2289 = vst [vmem:[#allocation2 + $0x8] sm:$0xf] %v2288_v3 }
 0x57f   : > { %v2286_v4 = vpop.f32.mrf.mxu0  ;;  %2619 = vmatpush.bf16.msra.mxu0 %v4150_v18 }
 0x583   : > { %v4920_v5 = vld [vmem:[#allocation2 + $0x8] sm:$0xf] }
 0x584   : > { %v2293_v7 = vld [vmem:[#allocation2 + $0x7] sm:$0xf]  ;;  %v2313_v9 = vmax.f32 %v4920_v5, 0.0 }
 0x585   : > { %v2454_v8 = vld [vmem:[#allocation2 + $0x9] sm:$0xf]  ;;  %v2294_v10 = vmax.f32 %v2293_v7, 0.0 }
 0x586   : > { %v2455_v11 = vmax.f32 %v2454_v8, 0.0  ;;  %v2331_v13 = vpack.c.bf16 %v2313_v9, %v2313_v9 }
 0x587   : > { %v2312_v14 = vpack.c.bf16 %v2294_v10, %v2294_v10 }
 0x588   : > { %v2473_v15 = vpack.c.bf16 %v2455_v11, %v2455_v11  ;;  %2388 = vmatmul.bf16.vlgmr.msrb.gmra.mxu1 %v2331_v13 }
 0x589   : > { %2449 = vmatmul.bf16.vlgmr.msrb.gmra.mxu2 %v2312_v14 }
 0x58a   : > { %2530 = vmatmul.bf16.vlgmr.msrb.gmra.mxu3 %v2473_v15 }
 0x605   : > { %v2389_v33 = vpop.f32.mrf.mxu1 }
 0x60c   : > { %v2450_v34 = vpop.f32.mrf.mxu2 }
 0x60d   : > { %v2451_v35 = vadd.f32 %v2450_v34, %v2389_v33  ;;  %v2531_v36 = vpop.f32.mrf.mxu3  ;;  %v2391_v38 = vpop.f32.mrf.mxu1 }
 0x60f   : > { %v2535_v39 = vadd.f32 %v2531_v36, %v2451_v35 }
 0x611   : > { %v2539_v32 = vadd.f32 %v4313_v37, %v2535_v39 }
 0x613   : > { %v2540_v40 = vmax.f32 %v2539_v32, 0.0 }
 0x614   : > { %v2452_v41 = vpop.f32.mrf.mxu2 }
 0x615   : > { %v2558_v27 = vpack.c.bf16 %v2540_v40, %v2540_v40  ;;  %v2533_v42 = vpop.f32.mrf.mxu3 }
 0x617   : > { %2620 = vmatmul.bf16.vlgmr.msra.gmra.mxu0 %v2558_v27 }
 0x694   : > { %v2621_v55 = vpop.f32.mrf.mxu0 }
 0x695   : > { %v2622_v56 = vadd.f32 %v4314_v54, %v2621_v55 }
 0x697   : > { %v2625_v57 = vadd.f32 %v2622_v56, %v4920_v5  ;;  %v4315_v5 = vld [vmem:[%s4974_s10] ss:$0 sm:$0xff] }
 0x699   : > { %2626 = vst [vmem:[#allocation2 + $0x8] sm:$0xf] %v2625_v57 }
 0x69c   : > { %v2623_v58 = vpop.f32.mrf.mxu0 }
 0x6a0   : > { %v2646_v59 = vld [vmem:[#allocation2 + $0x8] sm:$0xf] }
 0x6a1   : > { %v2628_v60 = vld [vmem:[#allocation2 + $0x7] sm:$0xf]  ;;  %v2664_v62 = vpack.c.bf16 %v2646_v59, %v2646_v59 }
 0x6a2   : > { %v2787_v61 = vld [vmem:[#allocation2 + $0x9] sm:$0xf]  ;;  %v2645_v63 = vpack.c.bf16 %v2628_v60, %v2628_v60 }
 0x6a3   : > { %v2805_v0 = vpack.c.bf16 %v2787_v61, %v2787_v61  ;;  %2721 = vmatmul.bf16.vlgmr.msra.gmra.mxu1 %v2664_v62 }
 0x6a4   : > { %2782 = vmatmul.bf16.vlgmr.msra.gmra.mxu2 %v2645_v63 }
 0x6a5   : > { %2862 = vmatmul.bf16.vlgmr.msra.gmra.mxu3 %v2805_v0 }
 0x720   : > { %v2722_v1 = vpop.f32.mrf.mxu1 }
 0x727   : > { %v2783_v2 = vpop.f32.mrf.mxu2 }
 0x728   : > { %v2784_v3 = vadd.f32 %v2783_v2, %v2722_v1  ;;  %v2863_v4 = vpop.f32.mrf.mxu3  ;;  %v2724_v7 = vpop.f32.mrf.mxu1 }
 0x72a   : > { %v2867_v8 = vadd.f32 %v2863_v4, %v2784_v3 }
 0x72c   : > { %v2871_v9 = vadd.f32 %v4315_v5, %v2867_v8 }
 0x72e   : > { %2872 = vst [vmem:[%s522_s12] sm:$0xf] %v2871_v9 }
 0x72f   : > { %v2785_v10 = vpop.f32.mrf.mxu2 }
 0x730   : > { %4583 = shalt.err (!%p4580_p9)
}
 0x731   : > { %4212 = dma.vmem_to_hbm [thread:$0]  (%p4829_p13), %s2887_s30, 64, %s2889_s29, %s2874_s24   ;;  %v2865_v11 = vpop.f32.mrf.mxu3 }
 0x732 PF: > { %s2900_s4 = sand.u32 1, %s4626_s17   ;;  %p4998_p10 = scmp.ge.s32.totalorder %s4638_s20, 2 }
 0x733   : > { %s2901_s28 = scalar_lea.sflag [#allocation5], %s2900_s4 }
 0x734   : > { %p4241_p11 = pnand %p4998_p10, %p4834_p4 }
 0x736   : > { %p4242_p0 = pneg %p4241_p11 }
 0x738   : > { %4621 = dma.done.wait (%p4242_p0), %s2901_s28, 64  }
 0x739   : > { %4623 = vsyncadd (%p4242_p0), %s2901_s28, 4294967232  ;;  %p28_p2 = scmp.ge.s32.totalorder %s4809_s23, 4   ;;  %s4999_s17 = smov %s4630_s18 }
 0x73a   : > { %s5000_s18 = smov %s4634_s19  ;;  %s5001_s19 = smov %s4821_s22 }
 0x73b   : > { %s5002_s20 = smov %s4809_s23  ;;  %30 = sbr.rel (!%p28_p2) target bundleno = 15 (0xf), region = 171 }
 0x740   :  { %2907 = vsyncpa [#allocation4], 1 }
 0x741   :  { %2909 = vsyncpa [#allocation4 + $0x1], 1 }
 0x742   :  { %2910 = vsyncpa [#allocation7], 1 }
 0x743   :  { %2911 = vsyncpa [#allocation10], 1 }
 0x744   :  { %2912 = vsyncpa [#allocation13], 1 }
 0x745   :  { %2913 = vsyncpa [#allocation16], 1 }
 0x746   :  { %2914 = vsyncpa [#allocation5], 1 }
 0x747   :  { %2916 = vsyncpa [#allocation5 + $0x1], 1 }

</bundles_post_ra>
